<compile_context>
chip_gen: v7x
topology: tpu7x:2x2x1
jax: 0.10.0
libtpu: 0.0.40
codegen_flags: <defaults>
</compile_context>

<pallas_src>
import jax
import jax.numpy as jnp
from jax import lax
from jax.experimental import pallas as pl
from jax.experimental.pallas import tpu as pltpu

H = W = 16            # spatial size of the example input
C1 = 16               # conv1 / conv2 output channels
KS = 3                # kernel size
R = 4                 # pixel-shuffle upscale factor
NEG_SLOPE = 0.2

HP = H + 2            # padded conv1-activation height (18)
WP = W + 2            # padded conv1-activation width  (18)
XW = W + 4            # input width padded by 2        (20)
HB = 24               # per-sample row block: HP rounded up to a multiple of 8
LC1 = WP * C1         # conv1 slab lane width  (288)
LC2 = W * C1          # output slab lane width (256)
K1 = KS * XW          # K of the fused conv1 matmul (60)
MAX_NB = 256 // HB    # samples per grid step so folded M stays <= ~256 MXU rows


def _sr_kernel(x1_ref, rmask_ref, w1_ref, b1_ref, w2_ref, b2_ref, out_ref):
    # x1_ref   : (MB, K1)        im2row'd padded input (batch folded, HB rows/sample)
    # rmask_ref: (MB, 1)         1.0 on interior conv1 rows, 0.0 on padded border rows
    # w1_ref   : (K1, LC1)       conv1 block-Toeplitz slab, K-fused over the 3 height
    #                            taps, lane-border column groups pre-zeroed
    # b1_ref   : (1, LC1)        conv1 bias tiled over the W+2 lane groups (borders 0)
    # w2_ref   : (KS, LC1, LC2)  conv2 block-Toeplitz slabs (one per height tap)
    # b2_ref   : (1, LC2)        conv2 bias tiled over the W lane groups
    # out_ref  : (MB, LC2)       rows r with r % HB < H hold tanh(conv2), lane-dense
    mb = out_ref.shape[0]
    m2 = mb - 2

    # conv1: one MXU matmul (K = 60), bias, LeakyReLU(0.2).
    a1 = jnp.dot(x1_ref[...], w1_ref[...], preferred_element_type=jnp.float32)
    a1 = a1 + b1_ref[...]
    y1 = jnp.where(a1 > 0, a1, NEG_SLOPE * a1)

    # Zero the top/bottom padded rows of each sample's block; together with the
    # zeroed border columns baked into w1/b1 this realizes conv2's SAME padding.
    y1 = y1 * rmask_ref[...]

    # conv2: three MXU matmuls (K = 288) over height-shifted slices of y1.
    acc = jnp.dot(y1[0:m2, :], w2_ref[0], preferred_element_type=jnp.float32)
    acc = acc + jnp.dot(y1[1:1 + m2, :], w2_ref[1], preferred_element_type=jnp.float32)
    acc = acc + jnp.dot(y1[2:2 + m2, :], w2_ref[2], preferred_element_type=jnp.float32)

    out_ref[0:m2, :] = jnp.tanh(acc + b2_ref[...])
    out_ref[m2:, :] = jnp.zeros((2, LC2), jnp.float32)   # alignment rows (discarded)


def _build_weight_slabs(w1_oihw, b1, w2_oihw, b2):
    """Block-Toeplitz weight slabs (built ONCE per weight set; cache the result).

    conv1 (K-fused over height taps, lane borders pre-zeroed):
        W1[kh*XW + u, j*C1 + c]   = w1[c, 0, kh, u - j]   for 0 <= u-j < 3 else 0,
                                    and 0 for border groups j in {0, W+1}
    conv2 (one slab per height tap):
        W2[kh][u*C1 + ci, w*C1 + co] = w2[co, ci, kh, u - w]  for 0 <= u-w < 3 else 0
    """
    # conv1
    w1_k = jnp.transpose(w1_oihw[:, 0], (1, 2, 0))             # (kh, kw, cout)
    u1 = jnp.arange(XW)
    j1 = jnp.arange(WP)
    d1 = u1[:, None] - j1[None, :]                             # (20, 18)
    v1 = (d1 >= 0) & (d1 < KS)
    d1c = jnp.clip(d1, 0, KS - 1)
    col_keep = ((j1 >= 1) & (j1 <= W)).astype(jnp.float32)     # zero j=0 / j=W+1
    B1 = jnp.stack([jnp.where(v1[:, :, None], w1_k[kh][d1c], 0.0)
                    for kh in range(KS)])                      # (3, 20, 18, 16)
    B1 = B1 * col_keep[None, None, :, None]
    w1cat = B1.reshape(K1, LC1)                                # (60, 288)
    b1t = (jnp.tile(b1, WP).reshape(WP, C1)
           * col_keep[:, None]).reshape(1, LC1)                # (1, 288)

    # conv2
    w2_k = jnp.transpose(w2_oihw, (2, 3, 1, 0))                # (kh, kw, cin, cout)
    u2 = jnp.arange(WP)
    j2 = jnp.arange(W)
    d2 = u2[:, None] - j2[None, :]                             # (18, 16)
    v2 = (d2 >= 0) & (d2 < KS)
    d2c = jnp.clip(d2, 0, KS - 1)
    w2slab = jnp.stack([
        jnp.transpose(jnp.where(v2[:, :, None, None], w2_k[kh][d2c], 0.0),
                      (0, 2, 1, 3)).reshape(LC1, LC2)
        for kh in range(KS)])                                  # (3, 288, 256)
    b2t = jnp.tile(b2, W).reshape(1, LC2)                      # (1, 256)
    return w1cat, b1t, w2slab, b2t


def _num_tensorcores():
    try:
        kind = jax.devices()[0].device_kind.lower()
    except Exception:
        return 1
    return 2 if "v7" in kind else 1


def _choose_grid(n, n_tc):
    """Pick (n_steps, nb): fewest grid steps with folded M = nb*HB <= ~256 rows;
    on 2-TensorCore chips (v7x) prefer a step count that shards across cores."""
    n_steps = n
    for s in range(1, n + 1):
        if n % s == 0 and (n // s) <= MAX_NB:
            n_steps = s
            break
    if n_tc > 1 and n_steps % n_tc != 0:
        for s in range(n_steps + 1, n + 1):
            if n % s == 0 and s % n_tc == 0:
                n_steps = s
                break
    return n_steps, n // n_steps


def _sr_forward(x_nchw, w1cat, b1t, w2slab, b2t):
    n, cin, h, w = x_nchw.shape
    assert cin == 1 and h == H and w == W, x_nchw.shape

    n_steps, nb = _choose_grid(n, _num_tensorcores())
    mb = nb * HB

    # Zero-pad spatially by 2, im2row the 3 height taps along lanes (K-fused
    # conv1 LHS), and pad each sample's row block from HP=18 to HB=24 rows so
    # batch-folded blocks stay 8-sublane aligned.  (Layout plumbing only.)
    x2 = jnp.pad(x_nchw[:, 0], ((0, 0), (2, 2), (2, 2)))              # (n, 20, 20)
    x1 = jnp.concatenate([x2[:, kh:kh + HP, :] for kh in range(KS)], axis=-1)
    x1 = jnp.pad(x1, ((0, 0), (0, HB - HP), (0, 0)))                  # (n, 24, 60)
    x1 = x1.reshape(n * HB, K1)

    # Multiplicative row mask: 1.0 on interior conv1 rows (1..16) of each block.
    rm = ((jnp.arange(HB) >= 1) & (jnp.arange(HB) <= H)).astype(jnp.float32)
    rmask = jnp.tile(rm, n).reshape(n * HB, 1)

    conv = pl.pallas_call(
        _sr_kernel,
        out_shape=jax.ShapeDtypeStruct((n * HB, LC2), jnp.float32),
        grid_spec=pltpu.PrefetchScalarGridSpec(
            num_scalar_prefetch=0,
            grid=(n_steps,),
            in_specs=[
                pl.BlockSpec((mb, K1), lambda i: (i, 0)),
                pl.BlockSpec((mb, 1), lambda i: (i, 0)),
                pl.BlockSpec((K1, LC1), lambda i: (0, 0)),
                pl.BlockSpec((1, LC1), lambda i: (0, 0)),
                pl.BlockSpec((KS, LC1, LC2), lambda i: (0, 0, 0)),
                pl.BlockSpec((1, LC2), lambda i: (0, 0)),
            ],
            out_specs=pl.BlockSpec((mb, LC2), lambda i: (i, 0)),
        ),
        compiler_params=pltpu.CompilerParams(
            dimension_semantics=("parallel",)),
    )(x1, rmask, w1cat, b1t, w2slab, b2t)

    # Keep the valid H rows per sample; (n, H, W*16) is byte-identical to NHWC
    # (n, H, W, 16) -> PixelShuffle(4).  channel c = i*R + j -> out[h*R+i, w*R+j].
    # (tanh was applied element-wise in-kernel; order vs. shuffle is irrelevant.)
    y = conv.reshape(n, HB, LC2)[:, :H, :]
    y = y.reshape(n, H, W, R, R)                   # (n, H, W, i, j)
    y = jnp.transpose(y, (0, 1, 3, 2, 4))          # (n, H, i, W, j)
    y = y.reshape(n, H * R, W * R)
    return y[:, None, :, :]                        # NCHW: (n, 1, 4H, 4W)


def make_sr_subpix_forward(w1_oihw, b1, w2_oihw, b2):
    """Build the (mostly-zero) block-Toeplitz weight slabs once per weight set
    and return a jitted forward that reuses them on every call."""
    slabs = _build_weight_slabs(jnp.asarray(w1_oihw, jnp.float32),
                                jnp.asarray(b1, jnp.float32),
                                jnp.asarray(w2_oihw, jnp.float32),
                                jnp.asarray(b2, jnp.float32))
    slabs = tuple(jax.block_until_ready(s) for s in slabs)

    @jax.jit
    def forward(x_nchw):
        return _sr_forward(x_nchw, *slabs)

    return forward


def _reference(x_nchw, w1_oihw, b1, w2_oihw, b2):
    """Pure-JAX reference reproducing the PyTorch forward exactly."""
    dn = ('NCHW', 'OIHW', 'NCHW')
    y = lax.conv_general_dilated(x_nchw, w1_oihw, (1, 1), 'SAME',
                                 dimension_numbers=dn)
    y = y + b1[None, :, None, None]
    y = jnp.where(y > 0, y, NEG_SLOPE * y)
    y = lax.conv_general_dilated(y, w2_oihw, (1, 1), 'SAME',
                                 dimension_numbers=dn)
    y = y + b2[None, :, None, None]
    n, c, h, w = y.shape
    y = y.reshape(n, c // (R * R), R, R, h, w)
    y = jnp.transpose(y, (0, 1, 4, 2, 5, 3)).reshape(n, c // (R * R), h * R, w * R)
    return jnp.tanh(y)


if __name__ == "__main__":
    key = jax.random.PRNGKey(0)
    k_x, k_w1, k_b1, k_w2, k_b2 = jax.random.split(key, 5)

    # Deterministic synthetic parameters (shapes from nn.Conv2d in __init__).
    x = jax.random.normal(k_x, (2, 1, H, W), jnp.float32)
    w1 = 0.2 * jax.random.normal(k_w1, (16, 1, 3, 3), jnp.float32)    # OIHW
    b1 = 0.1 * jax.random.normal(k_b1, (16,), jnp.float32)
    w2 = 0.1 * jax.random.normal(k_w2, (16, 16, 3, 3), jnp.float32)   # OIHW
    b2 = 0.1 * jax.random.normal(k_b2, (16,), jnp.float32)

    forward = make_sr_subpix_forward(w1, b1, w2, b2)   # slabs built once here
    out = jax.block_until_ready(forward(x))
    ref = jax.block_until_ready(_reference(x, w1, b1, w2, b2))

    assert out.shape == (2, 1, H * R, W * R), out.shape
    assert jnp.allclose(out, ref, rtol=1e-4, atol=1e-4), \
        float(jnp.max(jnp.abs(out - ref)))

    print("KERNEL_OK")
</pallas_src>

<mosaic_0001>
module attributes {stable_mosaic.version = 11 : i64} {
  func.func @_sr_kernel(%arg0: i32, %arg1: memref<48x60xf32, #tpu.memory_space<vmem>>, %arg2: memref<48x1xf32, #tpu.memory_space<vmem>>, %arg3: memref<60x288xf32, #tpu.memory_space<vmem>>, %arg4: memref<1x288xf32, #tpu.memory_space<vmem>>, %arg5: memref<3x288x256xf32, #tpu.memory_space<vmem>>, %arg6: memref<1x256xf32, #tpu.memory_space<vmem>>, %arg7: memref<48x256xf32, #tpu.memory_space<vmem>>) attributes {dimension_semantics = [#tpu.dimension_semantics<parallel>], iteration_bounds = array<i64: 1>, scalar_prefetch = 0 : i64, scratch_operands = 0 : i64, tpu.core_type = #tpu.core_type<tc>, window_params = [{transform_indices = @transform_0, window_bounds = array<i64: 48, 60>}, {transform_indices = @transform_1, window_bounds = array<i64: 48, 1>}, {pipeline_mode = #tpu.pipeline_mode<synchronous>, transform_indices = @transform_2, window_bounds = array<i64: 60, 288>}, {pipeline_mode = #tpu.pipeline_mode<synchronous>, transform_indices = @transform_3, window_bounds = array<i64: 1, 288>}, {pipeline_mode = #tpu.pipeline_mode<synchronous>, transform_indices = @transform_4, window_bounds = array<i64: 3, 288, 256>}, {pipeline_mode = #tpu.pipeline_mode<synchronous>, transform_indices = @transform_5, window_bounds = array<i64: 1, 256>}, {transform_indices = @transform_6, window_bounds = array<i64: 48, 256>}]} {
    %c0 = arith.constant 0 : index
    %c0_0 = arith.constant 0 : index
    %0 = vector.load %arg1[%c0, %c0_0] : memref<48x60xf32, #tpu.memory_space<vmem>>, vector<48x60xf32>
    %c0_1 = arith.constant 0 : index
    %c0_2 = arith.constant 0 : index
    %1 = vector.load %arg3[%c0_1, %c0_2] : memref<60x288xf32, #tpu.memory_space<vmem>>, vector<60x288xf32>
    %cst = arith.constant dense<0.000000e+00> : vector<48x288xf32>
    %2 = tpu.matmul %0, %1, %cst {dimension_numbers = #tpu.dot_dimension_numbers<[1], [0], [0], [1], [0, 0, 1, 1], [], []>} : vector<48x60xf32>, vector<60x288xf32>, vector<48x288xf32> -> vector<48x288xf32>
    %c0_3 = arith.constant 0 : index
    %c0_4 = arith.constant 0 : index
    %3 = vector.load %arg4[%c0_3, %c0_4] : memref<1x288xf32, #tpu.memory_space<vmem>>, vector<1x288xf32>
    %4 = vector.broadcast %3 : vector<1x288xf32> to vector<48x288xf32>
    %5 = arith.addf %2, %4 : vector<48x288xf32>
    %cst_5 = arith.constant 0.000000e+00 : f32
    %6 = vector.broadcast %cst_5 : f32 to vector<48x288xf32>
    %7 = arith.cmpf ogt, %5, %6 : vector<48x288xf32>
    %cst_6 = arith.constant 2.000000e-01 : f32
    %8 = vector.broadcast %cst_6 : f32 to vector<48x288xf32>
    %9 = arith.mulf %8, %5 : vector<48x288xf32>
    %10 = arith.select %7, %5, %9 : vector<48x288xi1>, vector<48x288xf32>
    %c0_7 = arith.constant 0 : index
    %c0_8 = arith.constant 0 : index
    %11 = vector.load %arg2[%c0_7, %c0_8] : memref<48x1xf32, #tpu.memory_space<vmem>>, vector<48x1xf32>
    %12 = vector.broadcast %11 : vector<48x1xf32> to vector<48x288xf32>
    %13 = arith.mulf %10, %12 : vector<48x288xf32>
    %14 = vector.extract_strided_slice %13 {offsets = [0, 0], sizes = [46, 288], strides = [1, 1]} : vector<48x288xf32> to vector<46x288xf32>
    %c0_9 = arith.constant 0 : index
    %c0_10 = arith.constant 0 : index
    %c0_11 = arith.constant 0 : index
    %15 = vector.load %arg5[%c0_9, %c0_10, %c0_11] : memref<3x288x256xf32, #tpu.memory_space<vmem>>, vector<1x288x256xf32>
    %16 = vector.shape_cast %15 : vector<1x288x256xf32> to vector<288x256xf32>
    %cst_12 = arith.constant dense<0.000000e+00> : vector<46x256xf32>
    %17 = tpu.matmul %14, %16, %cst_12 {dimension_numbers = #tpu.dot_dimension_numbers<[1], [0], [0], [1], [0, 0, 1, 1], [], []>} : vector<46x288xf32>, vector<288x256xf32>, vector<46x256xf32> -> vector<46x256xf32>
    %18 = vector.extract_strided_slice %13 {offsets = [1, 0], sizes = [46, 288], strides = [1, 1]} : vector<48x288xf32> to vector<46x288xf32>
    %c1 = arith.constant 1 : index
    %c0_13 = arith.constant 0 : index
    %c0_14 = arith.constant 0 : index
    %19 = vector.load %arg5[%c1, %c0_13, %c0_14] : memref<3x288x256xf32, #tpu.memory_space<vmem>>, vector<1x288x256xf32>
    %20 = vector.shape_cast %19 : vector<1x288x256xf32> to vector<288x256xf32>
    %cst_15 = arith.constant dense<0.000000e+00> : vector<46x256xf32>
    %21 = tpu.matmul %18, %20, %cst_15 {dimension_numbers = #tpu.dot_dimension_numbers<[1], [0], [0], [1], [0, 0, 1, 1], [], []>} : vector<46x288xf32>, vector<288x256xf32>, vector<46x256xf32> -> vector<46x256xf32>
    %22 = arith.addf %17, %21 : vector<46x256xf32>
    %23 = vector.extract_strided_slice %13 {offsets = [2, 0], sizes = [46, 288], strides = [1, 1]} : vector<48x288xf32> to vector<46x288xf32>
    %c2 = arith.constant 2 : index
    %c0_16 = arith.constant 0 : index
    %c0_17 = arith.constant 0 : index
    %24 = vector.load %arg5[%c2, %c0_16, %c0_17] : memref<3x288x256xf32, #tpu.memory_space<vmem>>, vector<1x288x256xf32>
    %25 = vector.shape_cast %24 : vector<1x288x256xf32> to vector<288x256xf32>
    %cst_18 = arith.constant dense<0.000000e+00> : vector<46x256xf32>
    %26 = tpu.matmul %23, %25, %cst_18 {dimension_numbers = #tpu.dot_dimension_numbers<[1], [0], [0], [1], [0, 0, 1, 1], [], []>} : vector<46x288xf32>, vector<288x256xf32>, vector<46x256xf32> -> vector<46x256xf32>
    %27 = arith.addf %22, %26 : vector<46x256xf32>
    %c0_19 = arith.constant 0 : index
    %c0_20 = arith.constant 0 : index
    %28 = vector.load %arg6[%c0_19, %c0_20] : memref<1x256xf32, #tpu.memory_space<vmem>>, vector<1x256xf32>
    %29 = vector.broadcast %28 : vector<1x256xf32> to vector<46x256xf32>
    %30 = arith.addf %27, %29 : vector<46x256xf32>
    %31 = math.tanh %30 : vector<46x256xf32>
    %c0_21 = arith.constant 0 : index
    %c0_22 = arith.constant 0 : index
    %32 = vector.load %arg7[%c0_21, %c0_22] : memref<48x256xf32, #tpu.memory_space<vmem>>, vector<46x256xf32>
    tpu.vector_store %arg7[%c0_21, %c0_22], %31 {strides = array<i32>} : memref<48x256xf32, #tpu.memory_space<vmem>>, vector<46x256xf32>,
    %cst_23 = arith.constant 0.000000e+00 : f32
    %33 = vector.broadcast %cst_23 : f32 to vector<2x256xf32>
    %c46 = arith.constant 46 : index
    %c0_24 = arith.constant 0 : index
    %34 = vector.load %arg7[%c46, %c0_24] : memref<48x256xf32, #tpu.memory_space<vmem>>, vector<2x256xf32>
    tpu.vector_store %arg7[%c46, %c0_24], %33 {strides = array<i32>} : memref<48x256xf32, #tpu.memory_space<vmem>>, vector<2x256xf32>,
    return
  }
  func.func @transform_0(%arg0: i32) -> (i32, i32) {
    %c0_i32 = arith.constant 0 : i32
    %c0_i32_0 = arith.constant 0 : i32
    return %arg0, %c0_i32 : i32, i32
  }
  func.func @transform_1(%arg0: i32) -> (i32, i32) {
    %c0_i32 = arith.constant 0 : i32
    %c0_i32_0 = arith.constant 0 : i32
    return %arg0, %c0_i32 : i32, i32
  }
  func.func @transform_2(%arg0: i32) -> (i32, i32) {
    %c0_i32 = arith.constant 0 : i32
    %c0_i32_0 = arith.constant 0 : i32
    %c0_i32_1 = arith.constant 0 : i32
    return %c0_i32, %c0_i32_0 : i32, i32
  }
  func.func @transform_3(%arg0: i32) -> (i32, i32) {
    %c0_i32 = arith.constant 0 : i32
    %c0_i32_0 = arith.constant 0 : i32
    %c0_i32_1 = arith.constant 0 : i32
    return %c0_i32, %c0_i32_0 : i32, i32
  }
  func.func @transform_4(%arg0: i32) -> (i32, i32, i32) {
    %c0_i32 = arith.constant 0 : i32
    %c0_i32_0 = arith.constant 0 : i32
    %c0_i32_1 = arith.constant 0 : i32
    %c0_i32_2 = arith.constant 0 : i32
    return %c0_i32, %c0_i32_0, %c0_i32_1 : i32, i32, i32
  }
  func.func @transform_5(%arg0: i32) -> (i32, i32) {
    %c0_i32 = arith.constant 0 : i32
    %c0_i32_0 = arith.constant 0 : i32
    %c0_i32_1 = arith.constant 0 : i32
    return %c0_i32, %c0_i32_0 : i32, i32
  }
  func.func @transform_6(%arg0: i32) -> (i32, i32) {
    %c0_i32 = arith.constant 0 : i32
    %c0_i32_0 = arith.constant 0 : i32
    return %arg0, %c0_i32 : i32, i32
  }
}

</mosaic_0001>

<bundles_post_ra>
// kernel: tile.8
= control target key start
LH: loop header
LB: loop body
LE: loop exit
PB: predicated region body
PF: predicated region fallthrough
CT: control target
= control target key end

     0   :  { %s22_s0 = inlined_call_operand.vmem [shape: f32[24], index: 0, kind: input, shape index: {}]   ;;  %s23_s1 = inlined_call_operand.vmem [shape: f32[2,24], index: 1, kind: output, shape index: {}]  }
   0x1   :  { %v4_v0 = vld [vmem:[%s22_s0] ss:$0 sm:$0xff] }
   0x2   :  { %5 = vst [vmem:[%s23_s1] sm:$0x3] %v4_v0 }

// kernel: tile.0
= control target key start
LH: loop header
LB: loop body
LE: loop exit
PB: predicated region body
PF: predicated region fallthrough
CT: control target
= control target key end

     0   :  { %s226_s8 = smov 125   ;;  %s227_s9 = smov 126   ;;  %vm7_vm0 = vcmask 7168   ;;  %s357_s0 = inlined_call_operand.vmem [shape: f32[2,24], index: 0, kind: input, shape index: {}]   ;;  %s358_s1 = inlined_call_operand.vmem [shape: f32[48,1], index: 1, kind: output, shape index: {}]  }
   0x1   :  { %v4_v0 = vld [vmem:[%s357_s0] sm:$0x3]  ;;  %s225_s0 = smov 127   ;;  %s228_s10 = smov 124  }
   0x2   :  { %5 = vst [vmem:[#allocation0] sm:$0x3] %v4_v0  ;;  %s52_s11 = smov 3  ;;  %s229_s12 = smov 123  }
   0x3   :  { %s230_s13 = smov 122   ;;  %s60_s14 = smov 3 }
   0x4   :  { %s68_s15 = smov 3  ;;  %s231_s16 = smov 121  }
   0x5   :  { %s232_s17 = smov 120   ;;  %s76_s18 = smov 3 }
   0x6   :  { %s84_s19 = smov 3  ;;  %s233_s20 = smov 119  }
   0x7   :  { %s234_s21 = smov 118   ;;  %s92_s22 = smov 3 }
   0x8   :  { %s100_s23 = smov 3  ;;  %s235_s24 = smov 117  }
   0x9   :  { %v9_v1 = vld [vmem:[#allocation0] sm:$0x3]   ;;  %s236_s25 = smov 116   ;;  %s108_s26 = smov 3 }
   0xa   :  { %v21_v2 = vld [vmem:[#allocation0] sm:$0x3]   ;;  %10 = vrot.lane.b32.xlu0 %v9_v1, %s225_s0  ;;  %s116_s27 = smov 3  ;;  %s237_s28 = smov 115  }
   0xb   :  { %22 = vrot.lane.b32.xlu1 %v21_v2, %s226_s8  ;;  %v15_v3 = vld [vmem:[#allocation0] sm:$0x3]   ;;  %s238_s29 = smov 114   ;;  %s124_s30 = smov 3 }
   0xc   :  { %v27_v4 = vld [vmem:[#allocation0] sm:$0x3]   ;;  %s132_s2 = smov 3  ;;  %s239_s3 = smov 113  }
   0xd   :  { %v33_v5 = vld [vmem:[#allocation0] sm:$0x3]   ;;  %s240_s4 = smov 112   ;;  %s140_s5 = smov 3 }
   0xe   :  { %16 = vrot.lane.b32.xlu0 %v15_v3, %s227_s9  ;;  %v39_v6 = vld [vmem:[#allocation0] sm:$0x3]   ;;  %s148_s6 = smov 3  ;;  %s241_s8 = smov 111  }
   0xf   :  { %28 = vrot.lane.b32.xlu1 %v27_v4, %s228_s10  ;;  %v45_v7 = vld [vmem:[#allocation0] sm:$0x3]   ;;  %s242_s9 = smov 110   ;;  %s156_s10 = smov 3 }
  0x10   :  { %v53_v8 = vld [vmem:[#allocation0 + $0x1] ss:$-1 sm:%s52_s11]   ;;  %s164_s11 = smov 3 }
  0x11   :  { %v61_v9 = vld [vmem:[#allocation0 + $0x1] ss:$-1 sm:%s60_s14]   ;;  %s172_s14 = smov 3 }
  0x12   :  { %34 = vrot.lane.b32.xlu0 %v33_v5, %s229_s12  ;;  %v69_v10 = vld [vmem:[#allocation0 + $0x1] ss:$-1 sm:%s68_s15]   ;;  %s243_s12 = smov 109   ;;  %s245_s15 = smov 107  }
  0x13   :  { %40 = vrot.lane.b32.xlu1 %v39_v6, %s230_s13  ;;  %v77_v11 = vld [vmem:[#allocation0 + $0x1] ss:$-1 sm:%s76_s18]   ;;  %s244_s13 = smov 108  }
  0x14   :  { %v85_v12 = vld [vmem:[#allocation0 + $0x1] ss:$-1 sm:%s84_s19]  }
  0x15   :  { %v93_v13 = vld [vmem:[#allocation0 + $0x1] ss:$-1 sm:%s92_s22]  }
  0x16   :  { %46 = vrot.lane.b32.xlu0 %v45_v7, %s231_s16  ;;  %v101_v14 = vld [vmem:[#allocation0 + $0x1] ss:$-1 sm:%s100_s23]   ;;  %s246_s16 = smov 106  }
  0x17   :  { %54 = vrot.lane.b32.xlu1 %v53_v8, %s232_s17  ;;  %v109_v15 = vld [vmem:[#allocation0 + $0x1] ss:$-1 sm:%s108_s26]   ;;  %s247_s17 = smov 105  }
  0x18   :  { %v117_v16 = vld [vmem:[#allocation0 + $0x1] ss:$-1 sm:%s116_s27]  }
  0x19   :  { %v125_v17 = vld [vmem:[#allocation0 + $0x1] ss:$-1 sm:%s124_s30]  }
  0x1a   :  { %62 = vrot.lane.b32.xlu0 %v61_v9, %s233_s20  ;;  %v133_v18 = vld [vmem:[#allocation0 + $0x1] ss:$-1 sm:%s132_s2]  }
  0x1b   :  { %70 = vrot.lane.b32.xlu1 %v69_v10, %s234_s21  ;;  %v6_v19 = vld [vmem:[#allocation0] sm:$0x3]  }
  0x1c   :  { %8 = vst.msk [vmem:[%s358_s1] ss:$24 sm:$0x3] %vm7_vm0, %v6_v19   ;;  %v141_v20 = vld [vmem:[#allocation0 + $0x1] ss:$-1 sm:%s140_s5]  }
  0x1d   :  { %v149_v21 = vld [vmem:[#allocation0 + $0x1] ss:$-1 sm:%s148_s6]  }
  0x1e   :  { %78 = vrot.lane.b32.xlu0 %v77_v11, %s235_s24  ;;  %v157_v22 = vld [vmem:[#allocation0 + $0x1] ss:$-1 sm:%s156_s10]  }
  0x1f   :  { %86 = vrot.lane.b32.xlu1 %v85_v12, %s236_s25  ;;  %v165_v23 = vld [vmem:[#allocation0 + $0x1] ss:$-1 sm:%s164_s11]  }
  0x20   :  { %v173_v24 = vld [vmem:[#allocation0 + $0x1] ss:$-1 sm:%s172_s14]  }
  0x22   :  { %94 = vrot.lane.b32.xlu0 %v93_v13, %s237_s28 }
  0x23   :  { %102 = vrot.lane.b32.xlu1 %v101_v14, %s238_s29 }
  0x26   :  { %110 = vrot.lane.b32.xlu0 %v109_v15, %s239_s3 }
  0x27   :  { %118 = vrot.lane.b32.xlu1 %v117_v16, %s240_s4 }
  0x2a   :  { %126 = vrot.lane.b32.xlu0 %v125_v17, %s241_s8 }
  0x2b   :  { %134 = vrot.lane.b32.xlu1 %v133_v18, %s242_s9 }
  0x2e   :  { %142 = vrot.lane.b32.xlu0 %v141_v20, %s243_s12 }
  0x2f   :  { %150 = vrot.lane.b32.xlu1 %v149_v21, %s244_s13 }
  0x32   :  { %158 = vrot.lane.b32.xlu0 %v157_v22, %s245_s15 }
  0x33   :  { %166 = vrot.lane.b32.xlu1 %v165_v23, %s246_s16 }
  0x36   :  { %174 = vrot.lane.b32.xlu0 %v173_v24, %s247_s17 }
  0x7c   :  { %v11_v25 = vpop.permute.xlu0 %10  }
  0x7d   :  { %v23_v26 = vpop.permute.xlu1 %22   ;;  %179 = vst.msk [vmem:[%s358_s1 + $0x1] ss:$24 sm:$0x3] %vm7_vm0, %v11_v25  }
  0x7e   :  { %181 = vst.msk [vmem:[%s358_s1 + $0x3] ss:$24 sm:$0x3] %vm7_vm0, %v23_v26  }
  0x80   :  { %v17_v27 = vpop.permute.xlu0 %16  }
  0x81   :  { %v29_v28 = vpop.permute.xlu1 %28   ;;  %180 = vst.msk [vmem:[%s358_s1 + $0x2] ss:$24 sm:$0x3] %vm7_vm0, %v17_v27  }
  0x82   :  { %182 = vst.msk [vmem:[%s358_s1 + $0x4] ss:$24 sm:$0x3] %vm7_vm0, %v29_v28  }
  0x84   :  { %v35_v29 = vpop.permute.xlu0 %34  }
  0x85   :  { %v41_v30 = vpop.permute.xlu1 %40   ;;  %183 = vst.msk [vmem:[%s358_s1 + $0x5] ss:$24 sm:$0x3] %vm7_vm0, %v35_v29  }
  0x86   :  { %184 = vst.msk [vmem:[%s358_s1 + $0x6] ss:$24 sm:$0x3] %vm7_vm0, %v41_v30  }
  0x88   :  { %v47_v31 = vpop.permute.xlu0 %46  }
  0x89   :  { %v55_v32 = vpop.permute.xlu1 %54   ;;  %185 = vst.msk [vmem:[%s358_s1 + $0x7] ss:$24 sm:$0x3] %vm7_vm0, %v47_v31  }
  0x8a   :  { %186 = vst.msk [vmem:[%s358_s1 + $0x20] ss:$-24 sm:$0x3] %vm7_vm0, %v55_v32  }
  0x8c   :  { %v63_v33 = vpop.permute.xlu0 %62  }
  0x8d   :  { %v71_v34 = vpop.permute.xlu1 %70   ;;  %187 = vst.msk [vmem:[%s358_s1 + $0x21] ss:$-24 sm:$0x3] %vm7_vm0, %v63_v33  }
  0x8e   :  { %188 = vst.msk [vmem:[%s358_s1 + $0x22] ss:$-24 sm:$0x3] %vm7_vm0, %v71_v34  }
  0x90   :  { %v79_v35 = vpop.permute.xlu0 %78  }
  0x91   :  { %v87_v36 = vpop.permute.xlu1 %86   ;;  %189 = vst.msk [vmem:[%s358_s1 + $0x23] ss:$-24 sm:$0x3] %vm7_vm0, %v79_v35  }
  0x92   :  { %190 = vst.msk [vmem:[%s358_s1 + $0x24] ss:$-24 sm:$0x3] %vm7_vm0, %v87_v36  }
  0x94   :  { %v95_v37 = vpop.permute.xlu0 %94  }
  0x95   :  { %v103_v38 = vpop.permute.xlu1 %102   ;;  %191 = vst.msk [vmem:[%s358_s1 + $0x25] ss:$-24 sm:$0x3] %vm7_vm0, %v95_v37  }
  0x96   :  { %192 = vst.msk [vmem:[%s358_s1 + $0x26] ss:$-24 sm:$0x3] %vm7_vm0, %v103_v38  }
  0x98   :  { %v111_v39 = vpop.permute.xlu0 %110  }
  0x99   :  { %v119_v40 = vpop.permute.xlu1 %118   ;;  %193 = vst.msk [vmem:[%s358_s1 + $0x27] ss:$-24 sm:$0x3] %vm7_vm0, %v111_v39  }
  0x9a   :  { %194 = vst.msk [vmem:[%s358_s1 + $0x28] ss:$-24 sm:$0x3] %vm7_vm0, %v119_v40  }
  0x9c   :  { %v127_v41 = vpop.permute.xlu0 %126  }
  0x9d   :  { %v135_v42 = vpop.permute.xlu1 %134   ;;  %195 = vst.msk [vmem:[%s358_s1 + $0x29] ss:$-24 sm:$0x3] %vm7_vm0, %v127_v41  }
  0x9e   :  { %196 = vst.msk [vmem:[%s358_s1 + $0x2a] ss:$-24 sm:$0x3] %vm7_vm0, %v135_v42  }
  0xa0   :  { %v143_v43 = vpop.permute.xlu0 %142  }
  0xa1   :  { %v151_v44 = vpop.permute.xlu1 %150   ;;  %197 = vst.msk [vmem:[%s358_s1 + $0x2b] ss:$-24 sm:$0x3] %vm7_vm0, %v143_v43  }
  0xa2   :  { %198 = vst.msk [vmem:[%s358_s1 + $0x2c] ss:$-24 sm:$0x3] %vm7_vm0, %v151_v44  }
  0xa4   :  { %v159_v45 = vpop.permute.xlu0 %158  }
  0xa5   :  { %v167_v46 = vpop.permute.xlu1 %166   ;;  %199 = vst.msk [vmem:[%s358_s1 + $0x2d] ss:$-24 sm:$0x3] %vm7_vm0, %v159_v45  }
  0xa6   :  { %200 = vst.msk [vmem:[%s358_s1 + $0x2e] ss:$-24 sm:$0x3] %vm7_vm0, %v167_v46  }
  0xa8   :  { %v175_v47 = vpop.permute.xlu0 %174  }
  0xa9   :  { %201 = vst.msk [vmem:[%s358_s1 + $0x2f] ss:$-24 sm:$0x3] %vm7_vm0, %v175_v47  }

// kernel: forward.1
= control target key start
LH: loop header
LB: loop body
LE: loop exit
PB: predicated region body
PF: predicated region fallthrough
CT: control target
= control target key end

     0   :  { %11 = vsyncpa [#allocation3], 0  ;;  %s1899_s21 = smov [#allocation2]   ;;  %s2465_s0 = inlined_call_operand.vmem [shape: f32[48,60], index: 0, kind: input, shape index: {}]   ;;  %s2466_s1 = inlined_call_operand.vmem [shape: f32[48,1], index: 1, kind: input, shape index: {}]   ;;  %s2467_s2 = inlined_call_operand.vmem [shape: f32[60,288], index: 2, kind: input, shape index: {}]   ;;  %s2468_s3 = inlined_call_operand.vmem [shape: f32[1,288], index: 3, kind: input, shape index: {}]   ;;  %s2469_s4 = inlined_call_operand.hbm [shape: f32[3,288,256], index: 4, kind: input, shape index: {}]   ;;  %s2470_s5 = inlined_call_operand.vmem [shape: f32[1,256], index: 5, kind: input, shape index: {}]   ;;  %s2471_s6 = inlined_call_operand.vmem [shape: f32[48,256], index: 6, kind: output, shape index: {}]  }
   0x1   :  { %s25_s22 = sshll.u32 %s1899_s21, 4  ;;  %s1875_s25 = scalar_lea.hbm %s2469_s4, 27648  ;;  %s26_s22 = int_to_ptr.vmem [resolvable:$true] %s25_s22 }
   0x2   :  { %p1876_p0 = scmp.ne.s32.totalorder %s2469_s4, %s1875_s25  ;;  %p1879_p1 = scmp.lt.u32.totalorder %s1875_s25, %s2469_s4 }
   0x4   :  { %p1881_p2 = pnand %p1879_p1, %p1876_p0 }
   0x6   :  { %1884 = shalt.err (!%p1881_p2)
}
   0x7   :  { %s1885_s30 = scalar_lea.vmem %s26_s22, 27648  ;;  %p1890_p4 = scmp.lt.s32.totalorder %s26_s22, %s26_s22 }
   0x8   :  { %p1886_p3 = scmp.ne.s32.totalorder %s26_s22, %s1885_s30  ;;  %p1891_p5 = scmp.lt.s32.totalorder %s1885_s30, %s1885_s30 }
   0xa   :  { %p1892_p6 = por %p1891_p5, %p1890_p4 }
   0xc   :  { %p1893_p7 = pnand %p1892_p6, %p1886_p3 }
   0xe   :  { %1896 = shalt.err (!%p1893_p7)
}
   0xf   :  { %s1900_s7 = smov 256   ;;  %s1901_s8 = smov 16  }
  0x10   :  { %31 = dma.hbm_to_vmem [thread:$0]  %s2469_s4, 27648, %s26_s22, [#allocation3], %s1900_s7, %s1900_s7, %s1901_s8  }
  0x11   :  { %1897 = dma.done.wait [#allocation3], 27648  }
  0x12   :  { %1898 = vsyncadd [#allocation3], 4294939648  ;;  %v1902_v0 = vmov 0.0   ;;  %v1903_v1 = vmov 0   ;;  %v44_v2 = vld [vmem:[%s2467_s2 + $0x8] sm:$0xff]  ;;  %v47_v3 = vld [vmem:[%s2467_s2 + $0x20] sm:$0xff] }
  0x13   :  { %177 = vmatprep.mubr.f32.mxu0 %v1902_v0  ;;  %1448 = vst [vmem:[%s2471_s6 + $0x50] sm:$0xc0] %v1902_v0  ;;  %1449 = vst [vmem:[%s2471_s6 + $0x58] sm:$0xc0] %v1902_v0  ;;  %1849 = vset.pattern.permute.xlu0 %v1903_v1  ;;  %v45_v4 = vld [vmem:[%s2467_s2 + $0x10] sm:$0xff]  ;;  %v1527_v5 = vpack.c.bf16 %v47_v3, %v44_v2  ;;  %v48_v6 = vld [vmem:[%s2467_s2 + $0x28] sm:$0xff] }
  0x14   :  { %1850 = vset.pattern.permute.xlu1 %v1903_v1  ;;  %v43_v7 = vld [vmem:[%s2467_s2] sm:$0xff]  ;;  %v46_v8 = vld [vmem:[%s2467_s2 + $0x18] sm:$0xff]  ;;  %v1545_v9 = vpack.c.bf16 %v48_v6, %v45_v4  ;;  %v53_v12 = vld [vmem:[%s2467_s2 + $0x50] sm:$0xff]  ;;  %vm103_vm0 = vcmask 1043456   ;;  %vm84_vm1 = vcmask 490496   ;;  %vm1904_vm2 = vmmov 1  }
  0x15   :  { %v1529_v10 = vpack.c.bf16 %v46_v8, %v43_v7  ;;  %v50_v11 = vld [vmem:[%s2467_s2 + $0x38] sm:$0xff]  ;;  %v51_v13 = vld [vmem:[%s2467_s2 + $0x40] sm:$0xff]  ;;  %1528 = vmatprep.subr.bf16.mxu0 %v1527_v5  ;;  %v49_v16 = vld [vmem:[%s2467_s2 + $0x30] sm:$0xff]  ;;  %vm580_vm8 = vcmask 1046528   ;;  %vm626_vm10 = vcmask 261120  }
  0x16   :  { %v1531_v14 = vpack.c.bf16 %v53_v12, %v50_v11  ;;  %v54_v15 = vld [vmem:[%s2467_s2 + $0x58] sm:$0xff]  ;;  %v52_v17 = vld [vmem:[%s2467_s2 + $0x48] sm:$0xff]  ;;  %1546 = vmatprep.subr.bf16.mxu1 %v1545_v9  ;;  %v59_v21 = vld [vmem:[%s2467_s2 + $0x80] sm:$0xff] }
  0x17   :  { %1530 = vmatpush1.bf16.msra.mxu0 %v1529_v10  ;;  %v1549_v18 = vpack.c.bf16 %v54_v15, %v51_v13  ;;  %v1533_v19 = vpack.c.bf16 %v52_v17, %v49_v16  ;;  %v56_v20 = vld [vmem:[%s2467_s2 + $0x68] sm:$0xff]  ;;  %v57_v22 = vld [vmem:[%s2467_s2 + $0x70] sm:$0xff]  ;;  %1548 = vmatpush3.bf16.msra.mxu1 %v1545_v9  ;;  %v55_v25 = vld [vmem:[%s2467_s2 + $0x60] sm:$0xff] }
  0x18   :  { %1532 = vmatprep.subr.bf16.mxu0 %v1531_v14  ;;  %v1535_v23 = vpack.c.bf16 %v59_v21, %v56_v20  ;;  %v60_v24 = vld [vmem:[%s2467_s2 + $0x88] sm:$0xff]  ;;  %v58_v26 = vld [vmem:[%s2467_s2 + $0x78] sm:$0xff]  ;;  %v65_v29 = vld [vmem:[%s2467_s2 + $0xb0] sm:$0xf] }
  0x19   :  { %1550 = vmatprep.subr.bf16.mxu1 %v1549_v18  ;;  %v1553_v27 = vpack.c.bf16 %v60_v24, %v57_v22  ;;  %v62_v28 = vld [vmem:[%s2467_s2 + $0x98] sm:$0xff]  ;;  %v63_v30 = vld [vmem:[%s2467_s2 + $0xa0] sm:$0xff]  ;;  %v1537_v32 = vpack.c.bf16 %v58_v26, %v55_v25  ;;  %v61_v35 = vld [vmem:[%s2467_s2 + $0x90] sm:$0xff] }
  0x1a   :  { %v66_v31 = vld [vmem:[%s2467_s2 + $0xb8] sm:$0xf]  ;;  %v37_v33 = vld [vmem:[%s2465_s0] sm:$0xff]  ;;  %v1539_v34 = vpack.c.bf16 %v65_v29, %v62_v28  ;;  %v64_v36 = vld [vmem:[%s2467_s2 + $0xa8] sm:$0xf] }
  0x1b   :  { %1534 = vmatpush1.bf16.msra.mxu0 %v1533_v19  ;;  %1552 = vmatpush3.bf16.msra.mxu1 %v1549_v18  ;;  %vm2036_vm3 = vmpackc.low %vm103_vm0, %vm1904_vm2  ;;  %v1557_v38 = vpack.c.bf16 %v66_v31, %v63_v30  ;;  %v363_v39 = vld [vmem:[%s2466_s1] sm:$0xff]  ;;  %v365_v40 = vld [vmem:[%s2466_s1 + $0x10] sm:$0xff]  ;;  %v1542_v42 = vpack.c.bf16 %v64_v36, %v61_v35 }
  0x1c   :  { %1536 = vmatprep.subr.bf16.mxu0 %v1535_v23  ;;  %1554 = vmatprep.subr.bf16.mxu1 %v1553_v27  ;;  %v364_v41 = vld [vmem:[%s2466_s1 + $0x8] sm:$0xff]  ;;  %v366_v43 = vld [vmem:[%s2466_s1 + $0x18] sm:$0xff]  ;;  %v490_v47 = vld [vmem:[#allocation2 + $0x240] sm:$0xff] }
  0x1d   :  { %1518 = vmatprep.mubr.msk.f32.mxu1 %vm84_vm1, %v37_v33  ;;  %371 = vperm.xlu0 %1849, %v363_v39   ;;  %v491_v44 = vld [vmem:[#allocation2 + $0x248] sm:$0xff]  ;;  %v493_v45 = vld [vmem:[#allocation2 + $0x258] sm:$0xff]  ;;  %v492_v48 = vld [vmem:[#allocation2 + $0x250] sm:$0xff] }
  0x1e   :  { %381 = vperm.xlu1 %1850, %v365_v40   ;;  %v1563_v46 = vpack.c.bf16 %v493_v45, %v491_v44  ;;  %v367_v49 = vld [vmem:[%s2466_s1 + $0x20] sm:$0xff]  ;;  %v495_v50 = vld [vmem:[#allocation2 + $0x268] sm:$0xff]  ;;  %v497_v51 = vld [vmem:[#allocation2 + $0x278] sm:$0xff]  ;;  %v1565_v55 = vpack.c.bf16 %v492_v48, %v490_v47 }
  0x1f   :  { %1538 = vmatpush1.bf16.msra.mxu0 %v1537_v32  ;;  %1556 = vmatpush3.bf16.msra.mxu1 %v1553_v27  ;;  %v38_v52 = vld [vmem:[%s2465_s0 + $0x8] sm:$0xff]  ;;  %v39_v53 = vld [vmem:[%s2465_s0 + $0x10] sm:$0xff]  ;;  %v1567_v56 = vpack.c.bf16 %v497_v51, %v495_v50  ;;  %v494_v57 = vld [vmem:[#allocation2 + $0x260] sm:$0xff] }
  0x20   :  { %1541 = vmatprep.subr.msk.bf16.mxu0 %vm2036_vm3, %v1539_v34  ;;  %1559 = vmatprep.subr.msk.bf16.mxu1 %vm2036_vm3, %v1557_v38  ;;  %v368_v54 = vld [vmem:[%s2466_s1 + $0x28] sm:$0xff]  ;;  %v496_v58 = vld [vmem:[#allocation2 + $0x270] sm:$0xff]  ;;  %v501_v60 = vld [vmem:[#allocation2 + $0x298] sm:$0xff] }
  0x21   :  { %376 = vperm.xlu0 %1849, %v364_v41   ;;  %v499_v59 = vld [vmem:[#allocation2 + $0x288] sm:$0xff]  ;;  %v40_v61 = vld [vmem:[%s2465_s0 + $0x18] sm:$0xff]  ;;  %v41_v62 = vld [vmem:[%s2465_s0 + $0x20] sm:$0xff]  ;;  %v1569_v63 = vpack.c.bf16 %v496_v58, %v494_v57 }
  0x22   :  { %386 = vperm.xlu1 %1850, %v366_v43   ;;  %v1571_v1 = vpack.c.bf16 %v501_v60, %v499_v59  ;;  %v498_v2 = vld [vmem:[#allocation2 + $0x280] sm:$0xff]  ;;  %v500_v3 = vld [vmem:[#allocation2 + $0x290] sm:$0xff]  ;;  %v503_v4 = vld [vmem:[#allocation2 + $0x2a8] sm:$0xff] }
  0x23   :  { %1544 = vmatpush1.bf16.msk.msra.mxu0 %vm2036_vm3, %v1542_v42  ;;  %1562 = vmatpush3.bf16.msk.msra.mxu1 %vm2036_vm3, %v1557_v38  ;;  %v505_v5 = vld [vmem:[#allocation2 + $0x2b8] sm:$0xff]  ;;  %v555_v6 = vld [vmem:[#allocation2 + $0x448] sm:$0xff]  ;;  %v1573_v9 = vpack.c.bf16 %v500_v3, %v498_v2  ;;  %v554_v11 = vld [vmem:[#allocation2 + $0x440] sm:$0xff] }
  0x24   :  { %1564 = vmatprep.subr.bf16.mxu1 %v1563_v46  ;;  %v42_v7 = vld [vmem:[%s2465_s0 + $0x28] sm:$0xff]  ;;  %v557_v8 = vld [vmem:[#allocation2 + $0x458] sm:$0xff]  ;;  %v556_v12 = vld [vmem:[#allocation2 + $0x450] sm:$0xff]  ;;  %v1575_v13 = vpack.c.bf16 %v505_v5, %v503_v4 }
  0x25   :  { %391 = vperm.xlu0 %1849, %v367_v49   ;;  %v1627_v10 = vpack.c.bf16 %v557_v8, %v555_v6  ;;  %v502_v14 = vld [vmem:[#allocation2 + $0x2a0] sm:$0xff]  ;;  %v504_v15 = vld [vmem:[#allocation2 + $0x2b0] sm:$0xff]  ;;  %v1629_v16 = vpack.c.bf16 %v556_v12, %v554_v11  ;;  %v507_v17 = vld [vmem:[#allocation2 + $0x2c8] sm:$0xff] }
  0x26   :  { %1457 = vmatmul.mubr.msk.f32.vlgmr.msra.gmra.mrb[0].mxu0 %vm84_vm1, %v37_v33  ;;  %1519 = vmatmul.mubr.msk.f32.vlgmr.msra.gmra.mrb[0].mxu1 %vm84_vm1, %v38_v52  ;;  %v509_v18 = vld [vmem:[#allocation2 + $0x2d8] sm:$0xff]  ;;  %v1577_v19 = vpack.c.bf16 %v504_v15, %v502_v14  ;;  %v506_v21 = vld [vmem:[#allocation2 + $0x2c0] sm:$0xff]  ;;  %v508_v22 = vld [vmem:[#allocation2 + $0x2d0] sm:$0xff] }
  0x27   :  { %183 = vmatprep.mubr.f32.mxu0 %v1902_v0  ;;  %1521 = vmatprep.mubr.msk.f32.mxu1 %vm84_vm1, %v39_v53  ;;  %v1579_v20 = vpack.c.bf16 %v509_v18, %v507_v17  ;;  %v511_v23 = vld [vmem:[#allocation2 + $0x2e8] sm:$0xff]  ;;  %v513_v24 = vld [vmem:[#allocation2 + $0x2f8] sm:$0xff]  ;;  %v1581_v25 = vpack.c.bf16 %v508_v22, %v506_v21  ;;  %v510_v27 = vld [vmem:[#allocation2 + $0x2e0] sm:$0xff] }
  0x28   :  { %396 = vperm.xlu1 %1850, %v368_v54   ;;  %1566 = vmatpush1.bf16.msra.mxu1 %v1565_v55  ;;  %v1583_v26 = vpack.c.bf16 %v513_v24, %v511_v23  ;;  %v512_v28 = vld [vmem:[#allocation2 + $0x2f0] sm:$0xff]  ;;  %v515_v29 = vld [vmem:[#allocation2 + $0x308] sm:$0xff]  ;;  %v517_v30 = vld [vmem:[#allocation2 + $0x318] sm:$0xff] }
  0x29   :  { %1568 = vmatprep.subr.bf16.mxu1 %v1567_v56  ;;  %1628 = vmatprep.subr.bf16.mxu0 %v1627_v10  ;;  %v1585_v31 = vpack.c.bf16 %v512_v28, %v510_v27  ;;  %v1587_v32 = vpack.c.bf16 %v517_v30, %v515_v29  ;;  %v514_v33 = vld [vmem:[#allocation2 + $0x300] sm:$0xff]  ;;  %v516_v34 = vld [vmem:[#allocation2 + $0x310] sm:$0xff]  ;;  %v519_v35 = vld [vmem:[#allocation2 + $0x328] sm:$0xff] }
  0x2a   :  { %1458 = vmatmul.mubr.msk.f32.gmra.mrb[2].mxu0 %vm84_vm1, %v38_v52  ;;  %1522 = vmatmul.mubr.msk.f32.gmra.mrb[2].mxu1 %vm84_vm1, %v40_v61  ;;  %v521_v36 = vld [vmem:[#allocation2 + $0x338] sm:$0xff]  ;;  %v1589_v37 = vpack.c.bf16 %v516_v34, %v514_v33  ;;  %v518_v39 = vld [vmem:[#allocation2 + $0x320] sm:$0xff]  ;;  %v520_v40 = vld [vmem:[#allocation2 + $0x330] sm:$0xff] }
  0x2b   :  { %189 = vmatprep.mubr.f32.mxu0 %v1902_v0  ;;  %1524 = vmatprep.mubr.msk.f32.mxu1 %vm84_vm1, %v41_v62  ;;  %v1591_v38 = vpack.c.bf16 %v521_v36, %v519_v35  ;;  %v523_v41 = vld [vmem:[#allocation2 + $0x348] sm:$0xff]  ;;  %v525_v42 = vld [vmem:[#allocation2 + $0x358] sm:$0xff]  ;;  %v1593_v43 = vpack.c.bf16 %v520_v40, %v518_v39  ;;  %v522_v45 = vld [vmem:[#allocation2 + $0x340] sm:$0xff]  ;;  %v69_v39 = vlaneseq }
  0x2c   :  { %1570 = vmatpush1.bf16.msra.mxu1 %v1569_v63  ;;  %1630 = vmatpush1.bf16.msra.mxu0 %v1629_v16  ;;  %v1595_v44 = vpack.c.bf16 %v525_v42, %v523_v41  ;;  %v524_v46 = vld [vmem:[#allocation2 + $0x350] sm:$0xff]  ;;  %v527_v47 = vld [vmem:[#allocation2 + $0x368] sm:$0xff]  ;;  %v529_v48 = vld [vmem:[#allocation2 + $0x378] sm:$0xff] }
  0x2d   :  { %1572 = vmatprep.subr.bf16.mxu1 %v1571_v1  ;;  %v1597_v49 = vpack.c.bf16 %v524_v46, %v522_v45  ;;  %v1599_v50 = vpack.c.bf16 %v529_v48, %v527_v47  ;;  %v526_v51 = vld [vmem:[#allocation2 + $0x360] sm:$0xff]  ;;  %v528_v52 = vld [vmem:[#allocation2 + $0x370] sm:$0xff]  ;;  %v533_v54 = vld [vmem:[#allocation2 + $0x398] sm:$0xff]  ;;  %v2099_v40 = vshrl.u32 %v69_v39, 7 }
  0x2e   :  { %1459 = vmatmul.mubr.msk.f32.gmra.mrb[4].mxu0 %vm84_vm1, %v39_v53  ;;  %1525 = vmatmul.mubr.msk.f32.gmra.mrb[4].mxu1 %vm84_vm1, %v42_v7  ;;  %v531_v53 = vld [vmem:[#allocation2 + $0x388] sm:$0xff]  ;;  %v1601_v55 = vpack.c.bf16 %v528_v52, %v526_v51  ;;  %v530_v57 = vld [vmem:[#allocation2 + $0x380] sm:$0xff]  ;;  %v532_v58 = vld [vmem:[#allocation2 + $0x390] sm:$0xff] }
  0x2f   :  { %195 = vmatprep.mubr.f32.mxu0 %v1902_v0  ;;  %v1603_v56 = vpack.c.bf16 %v533_v54, %v531_v53  ;;  %v535_v59 = vld [vmem:[#allocation2 + $0x3a8] sm:$0xff]  ;;  %v537_v60 = vld [vmem:[#allocation2 + $0x3b8] sm:$0xff]  ;;  %v534_v63 = vld [vmem:[#allocation2 + $0x3a0] sm:$0xff]  ;;  %v71_v41 = vsub.s32 0, %v2099_v40 }
  0x30   :  { %1574 = vmatpush1.bf16.msra.mxu1 %v1573_v9  ;;  %v536_v1 = vld [vmem:[#allocation2 + $0x3b0] sm:$0xff]  ;;  %v539_v3 = vld [vmem:[#allocation2 + $0x3c8] sm:$0xff]  ;;  %v541_v4 = vld [vmem:[#allocation2 + $0x3d8] sm:$0xff] }
  0x31   :  { %1576 = vmatprep.subr.bf16.mxu1 %v1575_v13  ;;  %v1609_v2 = vpack.c.bf16 %v536_v1, %v534_v63  ;;  %v1611_v5 = vpack.c.bf16 %v541_v4, %v539_v3  ;;  %v538_v6 = vld [vmem:[#allocation2 + $0x3c0] sm:$0xff]  ;;  %v543_v9 = vld [vmem:[#allocation2 + $0x3e8] sm:$0xff]  ;;  %v545_v10 = vld [vmem:[#allocation2 + $0x3f8] sm:$0xff] }
  0x32   :  { %1460 = vmatmul.mubr.msk.f32.gmra.mrb[6].mxu0 %vm84_vm1, %v40_v61  ;;  %v1605_v61 = vpack.c.bf16 %v532_v58, %v530_v57  ;;  %v1615_v11 = vpack.c.bf16 %v545_v10, %v543_v9  ;;  %v559_v12 = vld [vmem:[#allocation2 + $0x468] sm:$0xff]  ;;  %v561_v13 = vld [vmem:[#allocation2 + $0x478] sm:$0xff]  ;;  %v558_v15 = vld [vmem:[#allocation2 + $0x460] sm:$0xff] }
  0x33   :  { %201 = vmatprep.mubr.f32.mxu0 %v1902_v0  ;;  %v1631_v14 = vpack.c.bf16 %v561_v13, %v559_v12  ;;  %v560_v16 = vld [vmem:[#allocation2 + $0x470] sm:$0xff]  ;;  %v542_v17 = vld [vmem:[#allocation2 + $0x3e0] sm:$0xff]  ;;  %v547_v21 = vld [vmem:[#allocation2 + $0x408] sm:$0xff] }
  0x34   :  { %1578 = vmatpush1.bf16.msra.mxu1 %v1577_v19  ;;  %v1633_v18 = vpack.c.bf16 %v560_v16, %v558_v15  ;;  %v544_v19 = vld [vmem:[#allocation2 + $0x3f0] sm:$0xff]  ;;  %v549_v22 = vld [vmem:[#allocation2 + $0x418] sm:$0xff]  ;;  %v546_v24 = vld [vmem:[#allocation2 + $0x400] sm:$0xff] }
  0x35   :  { %1580 = vmatprep.subr.bf16.mxu1 %v1579_v20  ;;  %1632 = vmatprep.subr.bf16.mxu0 %v1631_v14  ;;  %v1617_v20 = vpack.c.bf16 %v544_v19, %v542_v17  ;;  %v1619_v23 = vpack.c.bf16 %v549_v22, %v547_v21  ;;  %v551_v27 = vld [vmem:[#allocation2 + $0x428] sm:$0xff]  ;;  %v553_v28 = vld [vmem:[#allocation2 + $0x438] sm:$0xff]  ;;  %v550_v30 = vld [vmem:[#allocation2 + $0x420] sm:$0xff] }
  0x36   :  { %1461 = vmatmul.mubr.msk.f32.gmra.mrb[8].mxu0 %vm84_vm1, %v41_v62  ;;  %v1607_v62 = vpack.c.bf16 %v537_v60, %v535_v59  ;;  %v1623_v29 = vpack.c.bf16 %v553_v28, %v551_v27  ;;  %v482_v33 = vld [vmem:[#allocation2 + $0x208] sm:$0xff]  ;;  %v484_v34 = vld [vmem:[#allocation2 + $0x218] sm:$0xff]  ;;  %v67_v42 = vld [vmem:[%s2468_s3] sm:$0x7] }
  0x37   :  { %207 = vmatprep.mubr.f32.mxu0 %v1902_v0  ;;  %1634 = vmatpush1.bf16.msra.mxu0 %v1633_v18  ;;  %v1699_v35 = vpack.c.bf16 %v484_v34, %v482_v33  ;;  %v418_v36 = vld [vmem:[#allocation2 + $0x8] sm:$0xff]  ;;  %v2109_v45 = vrot.slane %v67_v42, %v71_v41  ;;  %v2123_v52 = vld [vmem:[#allocation2] sm:$0xff]  ;;  %v2125_v53 = vld [vmem:[#allocation2 + $0x10] sm:$0xff] }
  0x38   :  { %1582 = vmatpush1.bf16.msra.mxu1 %v1581_v25  ;;  %v548_v25 = vld [vmem:[#allocation2 + $0x410] sm:$0xff]  ;;  %v2128_v57 = vld [vmem:[#allocation2 + $0x28] sm:$0xff]  ;;  %v2136_v63 = vld [vmem:[#allocation2 + $0x20] sm:$0xff]  ;;  %v1637_v4 = vpack.c.bf16 %v2125_v53, %v2123_v52 }
  0x39   :  { %1584 = vmatprep.subr.bf16.mxu1 %v1583_v26  ;;  %v1621_v26 = vpack.c.bf16 %v548_v25, %v546_v24  ;;  %1700 = vmatprep.subr.bf16.mxu0 %v1699_v35  ;;  %v2138_v1 = vld [vmem:[#allocation2 + $0x30] sm:$0xff]  ;;  %v2149_v10 = vld [vmem:[#allocation2 + $0x228] sm:$0xff]  ;;  %v2157_v17 = vld [vmem:[#allocation2 + $0x220] sm:$0xff] }
  0x3a   :  { %1462 = vmatmul.mubr.msk.f32.gmra.mrb[10].mxu0 %vm84_vm1, %v42_v7  ;;  %v540_v7 = vld [vmem:[#allocation2 + $0x3d0] sm:$0xff]  ;;  %v1641_v16 = vpack.c.bf16 %v2138_v1, %v2136_v63  ;;  %v2165_v25 = vld [vmem:[#allocation2 + $0x488] sm:$0xff] }
  0x3b   :  { %804 = vmatprep.mubr.f32.mxu0 %v1902_v0  ;;  %v1613_v8 = vpack.c.bf16 %v540_v7, %v538_v6  ;;  %v2145_v6 = vld [vmem:[#allocation2 + $0x58] sm:$0xff]  ;;  %v2163_v24 = vld [vmem:[#allocation2 + $0x230] sm:$0xff] }
  0x3c   :  { %1586 = vmatpush1.bf16.msra.mxu1 %v1585_v31  ;;  %v552_v31 = vld [vmem:[#allocation2 + $0x430] sm:$0xff]  ;;  %v1705_v39 = vpack.c.bf16 %v2163_v24, %v2157_v17 }
  0x3d   :  { %1588 = vmatprep.subr.bf16.mxu1 %v1587_v32  ;;  %v1625_v32 = vpack.c.bf16 %v552_v31, %v550_v30  ;;  %v431_v63 = vld [vmem:[#allocation2 + $0x70] sm:$0xff] }
  0x40   :  { %1590 = vmatpush1.bf16.msra.mxu1 %v1589_v37  ;;  %v420_v37 = vld [vmem:[#allocation2 + $0x18] sm:$0xff] }
  0x41   :  { %1592 = vmatprep.subr.bf16.mxu1 %v1591_v38  ;;  %v1635_v38 = vpack.c.bf16 %v420_v37, %v418_v36 }
  0x44   :  { %1594 = vmatpush1.bf16.msra.mxu1 %v1593_v43  ;;  %v79_v43 = vsub.s32 2, %v2099_v40 }
  0x45   :  { %1596 = vmatprep.subr.bf16.mxu1 %v1595_v44  ;;  %v2472_v44 = vsub.s32 1, %v2099_v40 }
  0x46   :  { %v2113_v47 = vrot.slane %v67_v42, %v79_v43 }
  0x47   :  { %v2117_v48 = vrot.slane %v67_v42, %v2472_v44 }
  0x48   :  { %1598 = vmatpush1.bf16.msra.mxu1 %v1597_v49  ;;  %v2119_v49 = vld [vmem:[#allocation2 + $0x200] sm:$0xff] }
  0x49   :  { %1600 = vmatprep.subr.bf16.mxu1 %v1599_v50  ;;  %v2121_v50 = vld [vmem:[#allocation2 + $0x210] sm:$0xff] }
  0x4c   :  { %1602 = vmatpush1.bf16.msra.mxu1 %v1601_v55 }
  0x4d   :  { %1604 = vmatprep.subr.bf16.mxu1 %v1603_v56 }
  0x50   :  { %1606 = vmatpush1.bf16.msra.mxu1 %v1605_v61  ;;  %v1701_v61 = vpack.c.bf16 %v2121_v50, %v2119_v49 }
  0x51   :  { %1608 = vmatprep.subr.bf16.mxu1 %v1607_v62  ;;  %v2134_v62 = vld [vmem:[#allocation2 + $0x38] sm:$0xff] }
  0x52   :  { %v1639_v15 = vpack.c.bf16 %v2134_v62, %v2128_v57 }
  0x54   :  { %1610 = vmatpush1.bf16.msra.mxu1 %v1609_v2 }
  0x55   :  { %1612 = vmatprep.subr.bf16.mxu1 %v1611_v5  ;;  %v2143_v5 = vld [vmem:[#allocation2 + $0x48] sm:$0xff] }
  0x58   :  { %1614 = vmatpush1.bf16.msra.mxu1 %v1613_v8 }
  0x59   :  { %1616 = vmatprep.subr.bf16.mxu1 %v1615_v11  ;;  %v2151_v11 = vld [vmem:[#allocation2 + $0x238] sm:$0xff] }
  0x5c   :  { %1618 = vmatpush1.bf16.msra.mxu1 %v1617_v20 }
  0x5d   :  { %1620 = vmatprep.subr.bf16.mxu1 %v1619_v23  ;;  %v1643_v23 = vpack.c.bf16 %v2145_v6, %v2143_v5  ;;  %v434_v6 = vld [vmem:[#allocation2 + $0x88] sm:$0xff] }
  0x60   :  { %1622 = vmatpush1.bf16.msra.mxu1 %v1621_v26  ;;  %v2167_v26 = vld [vmem:[#allocation2 + $0x498] sm:$0xff] }
  0x61   :  { %1624 = vmatprep.subr.bf16.mxu1 %v1623_v29  ;;  %v1707_v42 = vpack.c.bf16 %v2167_v26, %v2165_v25 }
  0x64   :  { %1626 = vmatpush1.bf16.msra.mxu1 %v1625_v32 }
  0x65   :  { %1636 = vmatprep.subr.bf16.mxu1 %v1635_v38  ;;  %v1703_v38 = vpack.c.bf16 %v2151_v11, %v2149_v10 }
  0x9c   :  { %v2111_v46 = vpop.permute.xlu0 %371 }
  0x9d   :  { %v2174_v30 = vpop.permute.xlu1 %381 }
  0xa0   :  { %v2147_v7 = vpop.permute.xlu0 %376 }
  0xf9   :  { %v179_v51 = vpop.f32.mrb[0].mxu0  ;;  %v1520_v55 = vpop.f32.mrb[0].mxu1 }
  0xfa   :  { %v180_v54 = vadd.f32 %v179_v51, %v2109_v45  ;;  %v181_v56 = vpop.f32.mrb[1].mxu0  ;;  %v286_v58 = vadd.f32 %v1520_v55, %v2113_v47  ;;  %v280_v60 = vpop.f32.mrb[1].mxu1 }
  0xfb   :  { %v182_v59 = vadd.f32 %v181_v56, %v2117_v48  ;;  %v281_v3 = vadd.f32 %v280_v60, %v2113_v47 }
  0xfc   :  { %vm309_vm4 = vcmp.gt.f32.partialorder %v180_v54, 0.0  ;;  %v327_v2 = vmul.f32 0.2, %v180_v54  ;;  %vm314_vm5 = vcmp.gt.f32.partialorder %v286_v58, 0.0  ;;  %v332_v8 = vmul.f32 0.2, %v286_v58 }
  0xfd   :  { %vm310_vm6 = vcmp.gt.f32.partialorder %v182_v59, 0.0  ;;  %v328_v9 = vmul.f32 0.2, %v182_v59  ;;  %vm311_vm7 = vcmp.gt.f32.partialorder %v281_v3, 0.0  ;;  %v329_v12 = vmul.f32 0.2, %v281_v3 }
  0xfe   :  { %v185_v13 = vpop.f32.mrb[2].mxu0  ;;  %v1523_v14 = vpop.f32.mrb[2].mxu1  ;;  %v345_v18 = vsel %vm309_vm4, %v180_v54, %v327_v2  ;;  %v350_v19 = vsel %vm314_vm5, %v286_v58, %v332_v8 }
  0xff   :  { %v186_v20 = vadd.f32 %v185_v13, %v2109_v45  ;;  %v187_v21 = vpop.f32.mrb[3].mxu0  ;;  %v290_v22 = vpop.f32.mrb[3].mxu1  ;;  %v2170_v27 = vmul.f32 %v2147_v7, %v350_v19  ;;  %v346_v28 = vsel %vm310_vm6, %v182_v59, %v328_v9  ;;  %v347_v29 = vsel %vm311_vm7, %v281_v3, %v329_v12 }
 0x100   :  { %v296_v31 = vadd.f32 %v1523_v14, %v2113_v47  ;;  %v2178_v32 = vmul.f32 %v2111_v46, %v347_v29  ;;  %v188_v34 = vadd.f32 %v187_v21, %v2117_v48  ;;  %v2182_v36 = vmul.f32 %v2111_v46, %v345_v18  ;;  %v387_v14 = vpop.permute.xlu1 %386 }
 0x101   :  { %vm312_vm9 = vcmp.gt.f32.partialorder %v186_v20, 0.0  ;;  %v330_v33 = vmul.f32 0.2, %v186_v20  ;;  %v191_v35 = vpop.f32.mrb[4].mxu0  ;;  %v1526_v37 = vpop.f32.mrb[4].mxu1  ;;  %v588_v43 = vrot.slane %v2170_v27, 1  ;;  %v2192_v51 = vmul.f32 %v2111_v46, %v346_v28 }
 0x102   :  { %vm320_vm11 = vcmp.gt.f32.partialorder %v296_v31, 0.0  ;;  %v193_v55 = vpop.f32.mrb[5].mxu0  ;;  %v300_v56 = vpop.f32.mrb[5].mxu1  ;;  %v338_v58 = vmul.f32 0.2, %v296_v31  ;;  %vm313_vm12 = vcmp.gt.f32.partialorder %v188_v34, 0.0  ;;  %v291_v60 = vadd.f32 %v290_v22, %v2113_v47 }
 0x103   :  { %v348_v54 = vsel %vm312_vm9, %v186_v20, %v330_v33  ;;  %v331_v59 = vmul.f32 0.2, %v188_v34  ;;  %v587_v2 = vrot.slane %v2178_v32, 1  ;;  %v192_v3 = vadd.f32 %v191_v35, %v2109_v45 }
 0x104   :  { %v306_v8 = vadd.f32 %v1526_v37, %v2113_v47  ;;  %v194_v9 = vadd.f32 %v193_v55, %v2117_v48  ;;  %v2200_v46 = vmul.f32 %v2147_v7, %v348_v54  ;;  %vm317_vm13 = vcmp.gt.f32.partialorder %v291_v60, 0.0 }
 0x105   :  { %v197_v12 = vpop.f32.mrb[6].mxu0  ;;  %v335_v13 = vmul.f32 0.2, %v291_v60  ;;  %v301_v18 = vadd.f32 %v300_v56, %v2113_v47  ;;  %v349_v20 = vsel %vm313_vm12, %v188_v34, %v331_v59  ;;  %vm315_vm14 = vcmp.gt.f32.partialorder %v192_v3, 0.0 }
 0x106   :  { %v199_v19 = vpop.f32.mrb[7].mxu0  ;;  %v333_v21 = vmul.f32 0.2, %v192_v3  ;;  %v344_v22 = vmul.f32 0.2, %v306_v8  ;;  %v356_v29 = vsel %vm320_vm11, %v296_v31, %v338_v58  ;;  %vm316_vm15 = vcmp.gt.f32.partialorder %v194_v9, 0.0 }
 0x107   :  { %v353_v28 = vsel %vm317_vm13, %v291_v60, %v335_v13  ;;  %v334_v33 = vmul.f32 0.2, %v194_v9  ;;  %vm323_vm0 = vcmp.gt.f32.partialorder %v301_v18, 0.0  ;;  %v341_v37 = vmul.f32 0.2, %v301_v18 }
 0x108   :  { %v351_v35 = vsel %vm315_vm14, %v192_v3, %v333_v21  ;;  %vm326_vm1 = vcmp.gt.f32.partialorder %v306_v8, 0.0  ;;  %v2205_v55 = vmul.f32 %v2147_v7, %v349_v20  ;;  %v198_v34 = vadd.f32 %v197_v12, %v2109_v45  ;;  %v2219_v7 = vpop.permute.xlu1 %396  ;;  %v392_v21 = vpop.permute.xlu0 %391 }
 0x109   :  { %v203_v54 = vpop.f32.mrb[8].mxu0  ;;  %v352_v44 = vsel %vm316_vm15, %v194_v9, %v334_v33  ;;  %v362_v47 = vsel %vm326_vm1, %v306_v8, %v344_v22  ;;  %v2209_v59 = vmul.f32 %v2174_v30, %v353_v28  ;;  %v2211_v60 = vmul.f32 %v387_v14, %v356_v29 }
 0x10a   :  { %v205_v56 = vpop.f32.mrb[9].mxu0  ;;  %v2214_v31 = vmul.f32 %v2174_v30, %v351_v35  ;;  %v589_v58 = vsel %vm580_vm8, %v587_v2, %v588_v43  ;;  %v359_v3 = vsel %vm323_vm0, %v301_v18, %v341_v37  ;;  %vm318_vm2 = vcmp.gt.f32.partialorder %v198_v34, 0.0 }
 0x10b   :  { %v336_v8 = vmul.f32 0.2, %v198_v34  ;;  %1470 = vmatmul.mubr.msk.f32.vlgmr.msra.gmra.mrb[12].mxu0 %vm626_vm10, %v589_v58  ;;  %v200_v9 = vadd.f32 %v199_v19, %v2117_v48  ;;  %v2224_v12 = vmul.f32 %v2174_v30, %v352_v44  ;;  %v2227_v13 = vmul.f32 %v2219_v7, %v362_v47 }
 0x10c   :  { %1702 = vmatpush1.bf16.msra.mxu0 %v1701_v61  ;;  %810 = vmatprep.mubr.f32.mxu0 %v1902_v0  ;;  %v204_v2 = vadd.f32 %v203_v54, %v2109_v45  ;;  %v584_v18 = vrot.slane %v2192_v51, 1  ;;  %v585_v44 = vrot.slane %v2205_v55, 1  ;;  %v2239_v49 = vmul.f32 %v392_v21, %v359_v3 }
 0x10d   :  { %v209_v20 = vpop.f32.mrb[10].mxu0  ;;  %v354_v22 = vsel %vm318_vm2, %v198_v34, %v336_v8  ;;  %vm319_vm3 = vcmp.gt.f32.partialorder %v200_v9, 0.0  ;;  %v337_v19 = vmul.f32 0.2, %v200_v9  ;;  %1704 = vmatprep.subr.bf16.mxu0 %v1703_v38  ;;  %v594_v61 = vrot.slane %v2209_v59, 1 }
 0x10e   :  { %v211_v30 = vpop.f32.mrb[11].mxu0  ;;  %vm321_vm4 = vcmp.gt.f32.partialorder %v204_v2, 0.0  ;;  %v339_v50 = vmul.f32 0.2, %v204_v2  ;;  %v2242_v28 = vmul.f32 %v387_v14, %v354_v22  ;;  %v586_v33 = vsel %vm580_vm8, %v584_v18, %v585_v44 }
 0x10f   :  { %v355_v29 = vsel %vm319_vm3, %v200_v9, %v337_v19  ;;  %v206_v35 = vadd.f32 %v205_v56, %v2117_v48  ;;  %703 = vmatprep.mubr.f32.mxu1 %v586_v33  ;;  %v595_v10 = vsel %vm580_vm8, %v588_v43, %v594_v61  ;;  %v581_v11 = vrot.slane %v2182_v36, 1  ;;  %v425_v9 = vld [vmem:[#allocation2 + $0x40] sm:$0xff] }
 0x110   :  { %v2246_v37 = vmul.f32 %v387_v14, %v355_v29  ;;  %v582_v38 = vrot.slane %v2200_v46, 1  ;;  %1706 = vmatpush1.bf16.msra.mxu0 %v1705_v39  ;;  %v357_v54 = vsel %vm321_vm4, %v204_v2, %v339_v50  ;;  %v210_v14 = vadd.f32 %v209_v20, %v2109_v45  ;;  %v427_v2 = vld [vmem:[#allocation2 + $0x50] sm:$0xff]  ;;  %v430_v20 = vld [vmem:[#allocation2 + $0x68] sm:$0xff]  ;;  %v429_v29 = vld [vmem:[#allocation2 + $0x60] sm:$0xff] }
 0x111   :  { %1471 = vmatmul.mubr.msk.f32.gmra.mrb[14].mxu0 %vm626_vm10, %v595_v10  ;;  %vm322_vm5 = vcmp.gt.f32.partialorder %v206_v35, 0.0  ;;  %v340_v47 = vmul.f32 0.2, %v206_v35  ;;  %1708 = vmatprep.subr.bf16.mxu0 %v1707_v42  ;;  %v592_v34 = vrot.slane %v2224_v12, 1  ;;  %v600_v17 = vrot.slane %v2211_v60, 1 }
 0x112   :  { %v583_v43 = vsel %vm580_vm8, %v581_v11, %v582_v38  ;;  %816 = vmatprep.mubr.f32.mxu0 %v1902_v0  ;;  %v212_v24 = vadd.f32 %v211_v30, %v2117_v48  ;;  %vm324_vm6 = vcmp.gt.f32.partialorder %v210_v14, 0.0  ;;  %v342_v56 = vmul.f32 0.2, %v210_v14 }
 0x113   :  { %v358_v39 = vsel %vm322_vm5, %v206_v35, %v340_v47  ;;  %704 = vmatmul.mubr.f32.vlgmr.msra.gmra.mrb[6].mxu1 %v583_v43  ;;  %v590_v45 = vrot.slane %v2214_v31, 1  ;;  %v593_v25 = vsel %vm580_vm8, %v585_v44, %v592_v34  ;;  %v601_v26 = vsel %vm580_vm8, %v594_v61, %v600_v17  ;;  %v435_v47 = vld [vmem:[#allocation2 + $0x90] sm:$0xff] }
 0x114   :  { %v2267_v58 = vmul.f32 %v392_v21, %v358_v39  ;;  %1638 = vmatpush1.bf16.msra.mxu1 %v1637_v4  ;;  %vm325_vm7 = vcmp.gt.f32.partialorder %v212_v24, 0.0  ;;  %v612_v42 = vrot.slane %v2227_v13, 1  ;;  %v2275_v48 = vmul.f32 %v392_v21, %v357_v54  ;;  %709 = vmatprep.mubr.f32.mxu1 %v593_v25  ;;  %v432_v21 = vld [vmem:[#allocation2 + $0x78] sm:$0xff]  ;;  %v433_v54 = vld [vmem:[#allocation2 + $0x80] sm:$0xff] }
 0x115   :  { %1472 = vmatmul.mubr.msk.f32.gmra.mrb[16].mxu0 %vm626_vm10, %v601_v26  ;;  %v343_v3 = vmul.f32 0.2, %v212_v24  ;;  %v598_v8 = vrot.slane %v2246_v37, 1  ;;  %1640 = vmatprep.subr.bf16.mxu1 %v1639_v15  ;;  %v591_v52 = vsel %vm580_vm8, %v582_v38, %v590_v45  ;;  %v606_v53 = vrot.slane %v2239_v49, 1  ;;  %v1056_v39 = vld [vmem:[#allocation2 + $0x480] sm:$0xff] }
 0x116   :  { %822 = vmatprep.mubr.f32.mxu0 %v1902_v0  ;;  %v596_v4 = vrot.slane %v2242_v28, 1  ;;  %v604_v18 = vrot.slane %v2267_v58, 1  ;;  %v360_v22 = vsel %vm324_vm6, %v210_v14, %v342_v56  ;;  %v1645_v44 = vpack.c.bf16 %v427_v2, %v425_v9  ;;  %v1058_v56 = vld [vmem:[#allocation2 + $0x490] sm:$0xff]  ;;  %v1063_v9 = vld [vmem:[#allocation2 + $0x4b8] sm:$0xff] }
 0x117   :  { %v361_v19 = vsel %vm325_vm7, %v212_v24, %v343_v3  ;;  %710 = vmatmul.mubr.f32.gmra.mrb[8].mxu1 %v591_v52  ;;  %v599_v57 = vsel %vm580_vm8, %v592_v34, %v598_v8  ;;  %v607_v15 = vsel %vm580_vm8, %v600_v17, %v606_v53  ;;  %v613_v50 = vsel %vm580_vm8, %v606_v53, %v612_v42  ;;  %v438_v17 = vld [vmem:[#allocation2 + $0xa8] sm:$0xff]  ;;  %v440_v24 = vld [vmem:[#allocation2 + $0xb8] sm:$0xff]  ;;  %v437_v53 = vld [vmem:[#allocation2 + $0xa0] sm:$0xff] }
 0x118   :  { %v2291_v62 = vmul.f32 %v2219_v7, %v361_v19  ;;  %1642 = vmatpush1.bf16.msra.mxu1 %v1641_v16  ;;  %715 = vmatprep.mubr.f32.mxu1 %v599_v57  ;;  %v605_v30 = vsel %vm580_vm8, %v598_v8, %v604_v18  ;;  %v1647_v61 = vpack.c.bf16 %v432_v21, %v430_v20  ;;  %v602_v33 = vrot.slane %v2275_v48, 1  ;;  %v1061_v8 = vld [vmem:[#allocation2 + $0x4a8] sm:$0xff]  ;;  %v444_v57 = vld [vmem:[#allocation2 + $0xd8] sm:$0xff] }
 0x119   :  { %1473 = vmatmul.mubr.msk.f32.gmra.mrb[18].mxu0 %vm626_vm10, %v607_v15  ;;  %1644 = vmatprep.subr.bf16.mxu1 %v1643_v23  ;;  %v2306_v1 = vmul.f32 %v2219_v7, %v360_v22  ;;  %v597_v16 = vsel %vm580_vm8, %v590_v45, %v596_v4  ;;  %v436_v23 = vld [vmem:[#allocation2 + $0x98] sm:$0xff]  ;;  %v1136_v35 = vrot.slane %v2170_v27, 2  ;;  %v1135_v10 = vrot.slane %v2178_v32, 2  ;;  %v442_v19 = vld [vmem:[#allocation2 + $0xc8] sm:$0xff] }
 0x11a   :  { %828 = vmatprep.mubr.f32.mxu0 %v1902_v0  ;;  %v610_v5 = vrot.slane %v2291_v62, 1  ;;  %v1649_v11 = vpack.c.bf16 %v431_v63, %v429_v29  ;;  %vm1128_vm9 = vcmask 1045504   ;;  %v1651_v38 = vpack.c.bf16 %v436_v23, %v434_v6  ;;  %v1065_v29 = vld [vmem:[#allocation2 + $0x4c8] sm:$0xff]  ;;  %v1067_v63 = vld [vmem:[#allocation2 + $0x4d8] sm:$0xff]  ;;  %v443_v6 = vld [vmem:[#allocation2 + $0xd0] sm:$0xff] }
 0x11b   :  { %716 = vmatmul.mubr.f32.gmra.mrb[10].mxu1 %v597_v16  ;;  %v1160_v14 = vrot.slane %v2227_v13, 2  ;;  %v603_v43 = vsel %vm580_vm8, %v596_v4, %v602_v33  ;;  %v608_v34 = vrot.slane %v2306_v1, 1  ;;  %v2321_v45 = vsel %vm1128_vm9, %v1135_v10, %v1136_v35  ;;  %v439_v4 = vld [vmem:[#allocation2 + $0xb0] sm:$0xff]  ;;  %v448_v10 = vld [vmem:[#allocation2 + $0xf8] sm:$0xff] }
 0x11c   :  { %1646 = vmatpush1.bf16.msra.mxu1 %v1645_v44  ;;  %721 = vmatprep.mubr.f32.mxu1 %v605_v30  ;;  %v611_v7 = vsel %vm580_vm8, %v604_v18, %v610_v5  ;;  %v1142_v25 = vrot.slane %v2209_v59, 2  ;;  %v1148_v26 = vrot.slane %v2211_v60, 2  ;;  %v1653_v3 = vpack.c.bf16 %v435_v47, %v433_v54  ;;  %v1060_v30 = vld [vmem:[#allocation2 + $0x4a0] sm:$0xff]  ;;  %v1069_v54 = vld [vmem:[#allocation2 + $0x4e8] sm:$0xff] }
 0x11d   :  { %1474 = vmatmul.mubr.msk.f32.gmra.mrb[20].mxu0 %vm626_vm10, %v613_v50  ;;  %1648 = vmatprep.subr.bf16.mxu1 %v1647_v61  ;;  %v1154_v2 = vrot.slane %v2239_v49, 2  ;;  %v1655_v52 = vpack.c.bf16 %v440_v24, %v438_v17  ;;  %v609_v21 = vsel %vm580_vm8, %v602_v33, %v608_v34  ;;  %v1709_v22 = vpack.c.bf16 %v1058_v56, %v1056_v39  ;;  %v1062_v50 = vld [vmem:[#allocation2 + $0x4b0] sm:$0xff]  ;;  %v441_v33 = vld [vmem:[#allocation2 + $0xc0] sm:$0xff]  ;;  %v450_v24 = vld [vmem:[#allocation2 + $0x108] sm:$0xff] }
 0x11e   :  { %834 = vmatprep.mubr.f32.mxu0 %v1902_v0  ;;  %v2330_v18 = vsel %vm1128_vm9, %v1136_v35, %v1142_v25  ;;  %v2333_v20 = vsel %vm1128_vm9, %v1142_v25, %v1148_v26  ;;  %v1711_v44 = vpack.c.bf16 %v1063_v9, %v1061_v8  ;;  %v1657_v61 = vpack.c.bf16 %v439_v4, %v437_v53  ;;  %v446_v35 = vld [vmem:[#allocation2 + $0xe8] sm:$0xff]  ;;  %v447_v17 = vld [vmem:[#allocation2 + $0xf0] sm:$0xff]  ;;  %v452_v39 = vld [vmem:[#allocation2 + $0x118] sm:$0xff] }
 0x11f   :  { %722 = vmatmul.mubr.f32.gmra.mrb[12].mxu1 %v603_v43  ;;  %v2338_v15 = vsel %vm1128_vm9, %v1148_v26, %v1154_v2  ;;  %v1659_v16 = vpack.c.bf16 %v444_v57, %v442_v19  ;;  %v1713_v23 = vpack.c.bf16 %v1062_v50, %v1060_v30  ;;  %v1663_v47 = vpack.c.bf16 %v448_v10, %v446_v35  ;;  %v445_v43 = vld [vmem:[#allocation2 + $0xe0] sm:$0xff]  ;;  %v1070_v26 = vld [vmem:[#allocation2 + $0x4f0] sm:$0xff]  ;;  %v1073_v8 = vld [vmem:[#allocation2 + $0x508] sm:$0xff] }
 0x120   :  { %1650 = vmatpush1.bf16.msra.mxu1 %v1649_v11  ;;  %727 = vmatprep.mubr.f32.mxu1 %v611_v7  ;;  %v1715_v11 = vpack.c.bf16 %v1067_v63, %v1065_v29  ;;  %v1066_v7 = vld [vmem:[#allocation2 + $0x4d0] sm:$0xff]  ;;  %v1068_v25 = vld [vmem:[#allocation2 + $0x4e0] sm:$0xff]  ;;  %v1075_v9 = vld [vmem:[#allocation2 + $0x518] sm:$0xff] }
 0x121   :  { %1475 = vmatmul.mubr.msk.f32.gmra.mrb[22].mxu0 %vm626_vm10, %v612_v42  ;;  %1652 = vmatprep.subr.bf16.mxu1 %v1651_v38  ;;  %v2343_v42 = vsel %vm1128_vm9, %v1154_v2, %v1160_v14  ;;  %v1661_v38 = vpack.c.bf16 %v443_v6, %v441_v33  ;;  %v449_v2 = vld [vmem:[#allocation2 + $0x100] sm:$0xff]  ;;  %v1721_v53 = vpack.c.bf16 %v1070_v26, %v1068_v25  ;;  %v454_v4 = vld [vmem:[#allocation2 + $0x128] sm:$0xff]  ;;  %v1074_v57 = vld [vmem:[#allocation2 + $0x510] sm:$0xff] }
 0x122   :  { %1018 = vmatprep.mubr.f32.mxu0 %v1902_v0  ;;  %v1072_v19 = vld [vmem:[#allocation2 + $0x500] sm:$0xff]  ;;  %v1077_v30 = vld [vmem:[#allocation2 + $0x528] sm:$0xff]  ;;  %v1079_v50 = vld [vmem:[#allocation2 + $0x538] sm:$0xff] }
 0x123   :  { %728 = vmatmul.mubr.f32.gmra.mrb[14].mxu1 %v609_v21  ;;  %v456_v21 = vld [vmem:[#allocation2 + $0x138] sm:$0xff]  ;;  %v455_v29 = vld [vmem:[#allocation2 + $0x130] sm:$0xff]  ;;  %v1725_v63 = vpack.c.bf16 %v1074_v57, %v1072_v19  ;;  %v1727_v6 = vpack.c.bf16 %v1079_v50, %v1077_v30 }
 0x124   :  { %1654 = vmatpush1.bf16.msra.mxu1 %v1653_v3  ;;  %733 = vmatprep.mubr.f32.mxu1 %v610_v5  ;;  %v1064_v5 = vld [vmem:[#allocation2 + $0x4c0] sm:$0xff]  ;;  %v1665_v3 = vpack.c.bf16 %v447_v17, %v445_v43  ;;  %v460_v33 = vld [vmem:[#allocation2 + $0x158] sm:$0xff]  ;;  %v1078_v35 = vld [vmem:[#allocation2 + $0x530] sm:$0xff]  ;;  %v1132_v17 = vrot.slane %v2192_v51, 2 }
 0x125   :  { %1656 = vmatprep.subr.bf16.mxu1 %v1655_v52  ;;  %1476 = vmatmul.mubr.msk.f32.vlgmr.msra.gmra.mrb[24].mxu0 %vm626_vm10, %v2178_v32  ;;  %v1071_v32 = vld [vmem:[#allocation2 + $0x4f8] sm:$0xff]  ;;  %v451_v52 = vld [vmem:[#allocation2 + $0x110] sm:$0xff] }
 0x126   :  { %1710 = vmatpush1.bf16.msra.mxu0 %v1709_v22  ;;  %1024 = vmatprep.mubr.f32.mxu0 %v1902_v0  ;;  %v1719_v56 = vpack.c.bf16 %v1071_v32, %v1069_v54  ;;  %v1723_v22 = vpack.c.bf16 %v1075_v9, %v1073_v8  ;;  %v1133_v54 = vrot.slane %v2205_v55, 2  ;;  %v464_v43 = vld [vmem:[#allocation2 + $0x178] sm:$0xff]  ;;  %v461_v8 = vld [vmem:[#allocation2 + $0x160] sm:$0xff]  ;;  %v463_v9 = vld [vmem:[#allocation2 + $0x170] sm:$0xff] }
 0x127   :  { %734 = vmatmul.mubr.f32.gmra.mrb[16].mxu1 %v608_v34  ;;  %1712 = vmatprep.subr.bf16.mxu0 %v1711_v44  ;;  %v1717_v34 = vpack.c.bf16 %v1066_v7, %v1064_v5  ;;  %v1669_v44 = vpack.c.bf16 %v451_v52, %v449_v2  ;;  %v1083_v5 = vld [vmem:[#allocation2 + $0x558] sm:$0xff]  ;;  %v457_v7 = vld [vmem:[#allocation2 + $0x140] sm:$0xff]  ;;  %v467_v30 = vld [vmem:[#allocation2 + $0x190] sm:$0xff] }
 0x128   :  { %1658 = vmatpush1.bf16.msra.mxu1 %v1657_v61  ;;  %917 = vmatprep.mubr.f32.mxu1 %v2192_v51  ;;  %v453_v61 = vld [vmem:[#allocation2 + $0x120] sm:$0xff]  ;;  %v1087_v25 = vld [vmem:[#allocation2 + $0x578] sm:$0xff]  ;;  %v1134_v26 = vsel %vm1128_vm9, %v1132_v17, %v1133_v54  ;;  %v1097_v17 = vld [vmem:[#allocation2 + $0x5c8] sm:$0xff] }
 0x129   :  { %1660 = vmatprep.subr.bf16.mxu1 %v1659_v16  ;;  %1477 = vmatmul.mubr.msk.f32.gmra.mrb[26].mxu0 %vm626_vm10, %v2170_v27  ;;  %v1667_v27 = vpack.c.bf16 %v452_v39, %v450_v24  ;;  %v458_v16 = vld [vmem:[#allocation2 + $0x148] sm:$0xff]  ;;  %v1673_v10 = vpack.c.bf16 %v455_v29, %v453_v61  ;;  %v1080_v24 = vld [vmem:[#allocation2 + $0x540] sm:$0xff]  ;;  %v1082_v39 = vld [vmem:[#allocation2 + $0x550] sm:$0xff] }
 0x12a   :  { %1714 = vmatpush1.bf16.msra.mxu0 %v1713_v23  ;;  %1030 = vmatprep.mubr.f32.mxu0 %v1902_v0  ;;  %v1076_v23 = vld [vmem:[#allocation2 + $0x520] sm:$0xff]  ;;  %v1733_v51 = vpack.c.bf16 %v1082_v39, %v1080_v24  ;;  %v468_v2 = vld [vmem:[#allocation2 + $0x198] sm:$0xff] }
 0x12b   :  { %1716 = vmatprep.subr.bf16.mxu0 %v1715_v11  ;;  %v1081_v11 = vld [vmem:[#allocation2 + $0x548] sm:$0xff]  ;;  %v1729_v32 = vpack.c.bf16 %v1078_v35, %v1076_v23  ;;  %v1091_v19 = vld [vmem:[#allocation2 + $0x598] sm:$0xff]  ;;  %v473_v39 = vld [vmem:[#allocation2 + $0x1c0] sm:$0xff] }
 0x12c   :  { %1662 = vmatpush1.bf16.msra.mxu1 %v1661_v38  ;;  %v459_v38 = vld [vmem:[#allocation2 + $0x150] sm:$0xff]  ;;  %v472_v61 = vld [vmem:[#allocation2 + $0x1b8] sm:$0xff] }
 0x12d   :  { %1664 = vmatprep.subr.bf16.mxu1 %v1663_v47  ;;  %1478 = vmatmul.mubr.msk.f32.gmra.mrb[28].mxu0 %vm626_vm10, %v2209_v59  ;;  %v1671_v59 = vpack.c.bf16 %v456_v21, %v454_v4  ;;  %v462_v47 = vld [vmem:[#allocation2 + $0x168] sm:$0xff]  ;;  %v1086_v4 = vld [vmem:[#allocation2 + $0x570] sm:$0xff]  ;;  %v1681_v21 = vpack.c.bf16 %v463_v9, %v461_v8  ;;  %v1095_v23 = vld [vmem:[#allocation2 + $0x5b8] sm:$0xff] }
 0x12e   :  { %1718 = vmatpush1.bf16.msra.mxu0 %v1717_v34  ;;  %1036 = vmatprep.mubr.f32.mxu0 %v1902_v0  ;;  %v1731_v34 = vpack.c.bf16 %v1083_v5, %v1081_v11  ;;  %v471_v11 = vld [vmem:[#allocation2 + $0x1b0] sm:$0xff]  ;;  %v1096_v8 = vld [vmem:[#allocation2 + $0x5c0] sm:$0xff] }
 0x12f   :  { %1720 = vmatprep.subr.bf16.mxu0 %v1719_v56  ;;  %v1677_v56 = vpack.c.bf16 %v459_v38, %v457_v7  ;;  %v476_v7 = vld [vmem:[#allocation2 + $0x1d8] sm:$0xff]  ;;  %v1098_v9 = vld [vmem:[#allocation2 + $0x5d0] sm:$0xff] }
 0x130   :  { %1666 = vmatpush1.bf16.msra.mxu1 %v1665_v3  ;;  %v1679_v3 = vpack.c.bf16 %v464_v43, %v462_v47  ;;  %v1094_v47 = vld [vmem:[#allocation2 + $0x5b0] sm:$0xff] }
 0x131   :  { %1668 = vmatprep.subr.bf16.mxu1 %v1667_v27  ;;  %1479 = vmatmul.mubr.msk.f32.gmra.mrb[30].mxu0 %vm626_vm10, %v2211_v60  ;;  %v1675_v60 = vpack.c.bf16 %v460_v33, %v458_v16  ;;  %v466_v27 = vld [vmem:[#allocation2 + $0x188] sm:$0xff]  ;;  %v1090_v16 = vld [vmem:[#allocation2 + $0x590] sm:$0xff] }
 0x132   :  { %1722 = vmatpush1.bf16.msra.mxu0 %v1721_v53  ;;  %1042 = vmatprep.mubr.f32.mxu0 %v1902_v0  ;;  %v1084_v53 = vld [vmem:[#allocation2 + $0x560] sm:$0xff]  ;;  %v1683_v57 = vpack.c.bf16 %v468_v2, %v466_v27  ;;  %v1101_v27 = vld [vmem:[#allocation2 + $0x5e8] sm:$0xff]  ;;  %v1103_v2 = vld [vmem:[#allocation2 + $0x5f8] sm:$0xff] }
 0x133   :  { %1724 = vmatprep.subr.bf16.mxu0 %v1723_v22  ;;  %v1089_v22 = vld [vmem:[#allocation2 + $0x588] sm:$0xff]  ;;  %v1737_v50 = vpack.c.bf16 %v1086_v4, %v1084_v53  ;;  %v477_v53 = vld [vmem:[#allocation2 + $0x1e0] sm:$0xff]  ;;  %v479_v4 = vld [vmem:[#allocation2 + $0x1f0] sm:$0xff] }
 0x134   :  { %1670 = vmatpush1.bf16.msra.mxu1 %v1669_v44  ;;  %v465_v44 = vld [vmem:[#allocation2 + $0x180] sm:$0xff]  ;;  %v1739_v29 = vpack.c.bf16 %v1091_v19, %v1089_v22  ;;  %v1121_v22 = vld [vmem:[#allocation2 + $0x688] sm:$0xff]  ;;  %v1123_v19 = vld [vmem:[#allocation2 + $0x698] sm:$0xff] }
 0x135   :  { %1672 = vmatprep.subr.bf16.mxu1 %v1671_v59  ;;  %1480 = vmatmul.mubr.msk.f32.gmra.mrb[32].mxu0 %vm626_vm10, %v2239_v49  ;;  %v1085_v49 = vld [vmem:[#allocation2 + $0x568] sm:$0xff]  ;;  %v1685_v33 = vpack.c.bf16 %v467_v30, %v465_v44  ;;  %v1100_v44 = vld [vmem:[#allocation2 + $0x5e0] sm:$0xff]  ;;  %v1102_v30 = vld [vmem:[#allocation2 + $0x5f0] sm:$0xff] }
 0x136   :  { %1726 = vmatpush1.bf16.msra.mxu0 %v1725_v63  ;;  %1048 = vmatprep.mubr.f32.mxu0 %v1902_v0  ;;  %v1735_v52 = vpack.c.bf16 %v1087_v25, %v1085_v49  ;;  %v470_v59 = vld [vmem:[#allocation2 + $0x1a8] sm:$0xff]  ;;  %v1088_v63 = vld [vmem:[#allocation2 + $0x580] sm:$0xff] }
 0x137   :  { %1728 = vmatprep.subr.bf16.mxu0 %v1727_v6  ;;  %v1093_v6 = vld [vmem:[#allocation2 + $0x5a8] sm:$0xff]  ;;  %v1687_v35 = vpack.c.bf16 %v472_v61, %v470_v59  ;;  %v1741_v5 = vpack.c.bf16 %v1090_v16, %v1088_v63  ;;  %v1107_v61 = vld [vmem:[#allocation2 + $0x618] sm:$0xff]  ;;  %v1120_v63 = vld [vmem:[#allocation2 + $0x680] sm:$0xff] }
 0x138   :  { %1674 = vmatpush1.bf16.msra.mxu1 %v1673_v10  ;;  %v469_v10 = vld [vmem:[#allocation2 + $0x1a0] sm:$0xff]  ;;  %v1743_v38 = vpack.c.bf16 %v1095_v23, %v1093_v6  ;;  %v478_v25 = vld [vmem:[#allocation2 + $0x1e8] sm:$0xff]  ;;  %v1122_v16 = vld [vmem:[#allocation2 + $0x690] sm:$0xff] }
 0x139   :  { %1676 = vmatprep.subr.bf16.mxu1 %v1675_v60  ;;  %1481 = vmatmul.mubr.msk.f32.gmra.mrb[34].mxu0 %vm626_vm10, %v2227_v13  ;;  %v474_v60 = vld [vmem:[#allocation2 + $0x1c8] sm:$0xff]  ;;  %v1689_v43 = vpack.c.bf16 %v471_v11, %v469_v10  ;;  %v1127_v23 = vld [vmem:[#allocation2 + $0x6b8] sm:$0xff]  ;;  %v1104_v10 = vld [vmem:[#allocation2 + $0x600] sm:$0xff] }
 0x13a   :  { %1730 = vmatpush1.bf16.msra.mxu0 %v1729_v32  ;;  %1250 = vmatprep.mubr.f32.mxu0 %v1134_v26  ;;  %v1092_v32 = vld [vmem:[#allocation2 + $0x5a0] sm:$0xff]  ;;  %v1691_v24 = vpack.c.bf16 %v476_v7, %v474_v60  ;;  %v480_v26 = vld [vmem:[#allocation2 + $0x1f8] sm:$0xff]  ;;  %v1105_v59 = vld [vmem:[#allocation2 + $0x608] sm:$0xff]  ;;  %v1773_v7 = vpack.c.bf16 %v1122_v16, %v1120_v63 }
 0x13b   :  { %1732 = vmatprep.subr.bf16.mxu0 %v1731_v34  ;;  %v1099_v34 = vld [vmem:[#allocation2 + $0x5d8] sm:$0xff]  ;;  %v1745_v49 = vpack.c.bf16 %v1094_v47, %v1092_v32  ;;  %v1125_v6 = vld [vmem:[#allocation2 + $0x6a8] sm:$0xff]  ;;  %v1106_v11 = vld [vmem:[#allocation2 + $0x610] sm:$0xff] }
 0x13c   :  { %1678 = vmatpush1.bf16.msra.mxu1 %v1677_v56  ;;  %v475_v56 = vld [vmem:[#allocation2 + $0x1d0] sm:$0xff]  ;;  %v1111_v60 = vld [vmem:[#allocation2 + $0x638] sm:$0xff]  ;;  %v1124_v32 = vld [vmem:[#allocation2 + $0x6a0] sm:$0xff] }
 0x13d   :  { %1680 = vmatprep.subr.bf16.mxu1 %v1679_v3  ;;  %v1747_v3 = vpack.c.bf16 %v1099_v34, %v1097_v17  ;;  %v1126_v47 = vld [vmem:[#allocation2 + $0x6b0] sm:$0xff]  ;;  %v1108_v34 = vld [vmem:[#allocation2 + $0x620] sm:$0xff] }
 0x13e   :  { %1734 = vmatpush1.bf16.msra.mxu0 %v1733_v51  ;;  %v1693_v51 = vpack.c.bf16 %v475_v56, %v473_v39  ;;  %v1113_v39 = vld [vmem:[#allocation2 + $0x648] sm:$0xff]  ;;  %v1115_v56 = vld [vmem:[#allocation2 + $0x658] sm:$0xff] }
 0x13f   :  { %1736 = vmatprep.subr.bf16.mxu0 %v1735_v52  ;;  %v1695_v52 = vpack.c.bf16 %v480_v26, %v478_v25  ;;  %v1763_v26 = vpack.c.bf16 %v1115_v56, %v1113_v39 }
 0x140   :  { %1682 = vmatpush1.bf16.msra.mxu1 %v1681_v21  ;;  %v1749_v21 = vpack.c.bf16 %v1098_v9, %v1096_v8  ;;  %v1114_v8 = vld [vmem:[#allocation2 + $0x650] sm:$0xff]  ;;  %v1117_v9 = vld [vmem:[#allocation2 + $0x668] sm:$0xff] }
 0x141   :  { %1684 = vmatprep.subr.bf16.mxu1 %v1683_v57  ;;  %v1751_v57 = vpack.c.bf16 %v1103_v2, %v1101_v27 }
 0x142   :  { %1738 = vmatpush1.bf16.msra.mxu0 %v1737_v50  ;;  %v1697_v50 = vpack.c.bf16 %v479_v4, %v477_v53  ;;  %v1118_v53 = vld [vmem:[#allocation2 + $0x670] sm:$0xff] }
 0x143   :  { %1740 = vmatprep.subr.bf16.mxu0 %v1739_v29  ;;  %v1771_v29 = vpack.c.bf16 %v1123_v19, %v1121_v22  ;;  %v1140_v22 = vrot.slane %v2224_v12, 2  ;;  %v1129_v19 = vrot.slane %v2182_v36, 2 }
 0x144   :  { %1686 = vmatpush1.bf16.msra.mxu1 %v1685_v33  ;;  %v1753_v33 = vpack.c.bf16 %v1102_v30, %v1100_v44  ;;  %v1138_v44 = vrot.slane %v2214_v31, 2 }
 0x145   :  { %1688 = vmatprep.subr.bf16.mxu1 %v1687_v35  ;;  %v1755_v35 = vpack.c.bf16 %v1107_v61, %v1105_v59  ;;  %v1141_v30 = vsel %vm1128_vm9, %v1133_v54, %v1140_v22  ;;  %v1150_v54 = vrot.slane %v2275_v48, 2 }
 0x146   :  { %1742 = vmatpush1.bf16.msra.mxu0 %v1741_v5  ;;  %v1109_v5 = vld [vmem:[#allocation2 + $0x628] sm:$0xff] }
 0x147   :  { %1744 = vmatprep.subr.bf16.mxu0 %v1743_v38  ;;  %v1775_v38 = vpack.c.bf16 %v1127_v23, %v1125_v6  ;;  %v1759_v17 = vpack.c.bf16 %v1111_v60, %v1109_v5 }
 0x148   :  { %1690 = vmatpush1.bf16.msra.mxu1 %v1689_v43  ;;  %v1757_v43 = vpack.c.bf16 %v1106_v11, %v1104_v10 }
 0x149   :  { %1692 = vmatprep.subr.bf16.mxu1 %v1691_v24  ;;  %v1110_v24 = vld [vmem:[#allocation2 + $0x630] sm:$0xff] }
 0x14a   :  { %1746 = vmatpush1.bf16.msra.mxu0 %v1745_v49  ;;  %v1777_v49 = vpack.c.bf16 %v1126_v47, %v1124_v32  ;;  %v1761_v25 = vpack.c.bf16 %v1110_v24, %v1108_v34 }
 0x14b   :  { %1748 = vmatprep.subr.bf16.mxu0 %v1747_v3  ;;  %v1112_v3 = vld [vmem:[#allocation2 + $0x640] sm:$0xff] }
 0x14c   :  { %1694 = vmatpush1.bf16.msra.mxu1 %v1693_v51  ;;  %v1119_v51 = vld [vmem:[#allocation2 + $0x678] sm:$0xff]  ;;  %v1765_v27 = vpack.c.bf16 %v1114_v8, %v1112_v3 }
 0x14d   :  { %1696 = vmatprep.subr.bf16.mxu1 %v1695_v52  ;;  %v1767_v2 = vpack.c.bf16 %v1119_v51, %v1117_v9  ;;  %v1116_v52 = vld [vmem:[#allocation2 + $0x660] sm:$0xff] }
 0x14e   :  { %1750 = vmatpush1.bf16.msra.mxu0 %v1749_v21  ;;  %v1769_v4 = vpack.c.bf16 %v1118_v53, %v1116_v52  ;;  %v1130_v21 = vrot.slane %v2200_v46, 2 }
 0x14f   :  { %1752 = vmatprep.subr.bf16.mxu0 %v1751_v57 }
 0x150   :  { %1698 = vmatpush1.bf16.msra.mxu1 %v1697_v50  ;;  %v1131_v57 = vsel %vm1128_vm9, %v1129_v19, %v1130_v21 }
 0x151   :  { %1779 = vmatprep.subr.bf16.mxu1 %v1771_v29 }
 0x152   :  { %1754 = vmatpush1.bf16.msra.mxu0 %v1753_v33 }
 0x153   :  { %918 = vmatmul.mubr.f32.vlgmr.msra.gmra.mrb[18].mxu1 %v2182_v36  ;;  %1756 = vmatprep.subr.bf16.mxu0 %v1755_v35  ;;  %v1139_v36 = vsel %vm1128_vm9, %v1130_v21, %v1138_v44 }
 0x154   :  { %923 = vmatprep.mubr.f32.mxu1 %v2205_v55  ;;  %1781 = vmatpush1.bf16.msra.mxu1 %v1773_v7  ;;  %v1152_v55 = vrot.slane %v2267_v58, 2 }
 0x155   :  { %1780 = vmatprep.subr.bf16.mxu1 %v1775_v38 }
 0x156   :  { %1758 = vmatpush1.bf16.msra.mxu0 %v1757_v43 }
 0x157   :  { %924 = vmatmul.mubr.f32.gmra.mrb[20].mxu1 %v2200_v46  ;;  %1760 = vmatprep.subr.bf16.mxu0 %v1759_v17  ;;  %v1146_v46 = vrot.slane %v2246_v37, 2 }
 0x158   :  { %929 = vmatprep.mubr.f32.mxu1 %v2224_v12  ;;  %1782 = vmatpush1.bf16.msra.mxu1 %v1777_v49  ;;  %v1144_v12 = vrot.slane %v2242_v28, 2 }
 0x159   :  { %v1153_v50 = vsel %vm1128_vm9, %v1146_v46, %v1152_v55 }
 0x15a   :  { %1762 = vmatpush1.bf16.msra.mxu0 %v1761_v25  ;;  %v1151_v59 = vsel %vm1128_vm9, %v1144_v12, %v1150_v54 }
 0x15b   :  { %930 = vmatmul.mubr.f32.gmra.mrb[22].mxu1 %v2214_v31  ;;  %1764 = vmatprep.subr.bf16.mxu0 %v1763_v26  ;;  %v1147_v31 = vsel %vm1128_vm9, %v1140_v22, %v1146_v46 }
 0x15c   :  { %935 = vmatprep.mubr.f32.mxu1 %v2246_v37  ;;  %v1145_v37 = vsel %vm1128_vm9, %v1138_v44, %v1144_v12 }
 0x15e   :  { %1766 = vmatpush1.bf16.msra.mxu0 %v1765_v27 }
 0x15f   :  { %936 = vmatmul.mubr.f32.gmra.mrb[24].mxu1 %v2242_v28  ;;  %1768 = vmatprep.subr.bf16.mxu0 %v1767_v2  ;;  %v1158_v28 = vrot.slane %v2291_v62, 2 }
 0x160   :  { %941 = vmatprep.mubr.f32.mxu1 %v2267_v58  ;;  %v1156_v58 = vrot.slane %v2306_v1, 2 }
 0x161   :  { %v1159_v61 = vsel %vm1128_vm9, %v1152_v55, %v1158_v28 }
 0x162   :  { %1770 = vmatpush1.bf16.msra.mxu0 %v1769_v4  ;;  %v1157_v13 = vsel %vm1128_vm9, %v1150_v54, %v1156_v58 }
 0x163   :  { %942 = vmatmul.mubr.f32.gmra.mrb[26].mxu1 %v2275_v48  ;;  %1772 = vmatprep.subr.bf16.mxu0 %v1771_v29 }
 0x164   :  { %947 = vmatprep.mubr.f32.mxu1 %v2291_v62 }
 0x165   :  { %1251 = vmatmul.mubr.f32.vlgmr.msra.gmra.mrb[24].mxu0 %v1131_v57 }
 0x166   :  { %1256 = vmatprep.mubr.f32.mxu0 %v1141_v30  ;;  %1774 = vmatpush1.bf16.msra.mxu0 %v1773_v7 }
 0x167   :  { %948 = vmatmul.mubr.f32.gmra.mrb[28].mxu1 %v2306_v1  ;;  %1776 = vmatprep.subr.bf16.mxu0 %v1775_v38 }
 0x168   :  { %1381 = vmatprep.mubr.f32.mxu1 %v1902_v0 }
 0x169   :  { %1257 = vmatmul.mubr.f32.gmra.mrb[26].mxu0 %v1139_v36 }
 0x16a   :  { %1262 = vmatprep.mubr.f32.mxu0 %v1147_v31  ;;  %1778 = vmatpush1.bf16.msra.mxu0 %v1777_v49 }
 0x16b   :  { %1487 = vmatmul.mubr.msk.f32.vlgmr.msra.gmra.mrb[30].mxu1 %vm626_vm10, %v1160_v14 }
 0x16d   :  { %1263 = vmatmul.mubr.f32.gmra.mrb[28].mxu0 %v1145_v37 }
 0x16e   :  { %1268 = vmatprep.mubr.f32.mxu0 %v1153_v50 }
 0x171   :  { %1269 = vmatmul.mubr.f32.gmra.mrb[30].mxu0 %v1151_v59 }
 0x172   :  { %1274 = vmatprep.mubr.f32.mxu0 %v1159_v61 }
 0x175   :  { %1275 = vmatmul.mubr.f32.gmra.mrb[32].mxu0 %v1157_v13 }
 0x176   :  { %1280 = vmatprep.mubr.f32.mxu0 %v1158_v28 }
 0x179   :  { %1281 = vmatmul.mubr.f32.gmra.mrb[34].mxu0 %v1156_v58 }
 0x17a   :  { %1351 = vmatprep.mubr.f32.mxu0 %v1902_v0 }
 0x17d   :  { %1482 = vmatmul.mubr.msk.f32.vlgmr.msra.gmra.mrb[24].mxu0 %vm626_vm10, %v2321_v45 }
 0x17e   :  { %1357 = vmatprep.mubr.f32.mxu0 %v1902_v0 }
 0x181   :  { %1483 = vmatmul.mubr.msk.f32.gmra.mrb[26].mxu0 %vm626_vm10, %v2330_v18 }
 0x182   :  { %1363 = vmatprep.mubr.f32.mxu0 %v1902_v0 }
 0x185   :  { %1484 = vmatmul.mubr.msk.f32.gmra.mrb[28].mxu0 %vm626_vm10, %v2333_v20 }
 0x186   :  { %1369 = vmatprep.mubr.f32.mxu0 %v1902_v0 }
 0x189   :  { %1485 = vmatmul.mubr.msk.f32.gmra.mrb[30].mxu0 %vm626_vm10, %v2338_v15 }
 0x18a   :  { %1375 = vmatprep.mubr.f32.mxu0 %v1902_v0 }
 0x18d   :  { %1486 = vmatmul.mubr.msk.f32.gmra.mrb[32].mxu0 %vm626_vm10, %v2343_v42 }
 0x1de   :  { %v806_v48 = vpop.f32.mrb[12].mxu0 }
 0x1df   :  { %v808_v62 = vpop.f32.mrb[13].mxu0 }
 0x1e4   :  { %v812_v1 = vpop.f32.mrb[14].mxu0 }
 0x1e5   :  { %v814_v14 = vpop.f32.mrb[15].mxu0 }
 0x1e6   :  { %v705_v45 = vpop.f32.mrb[6].mxu1 }
 0x1e7   :  { %v807_v18 = vadd.f32 %v806_v48, %v705_v45  ;;  %v707_v29 = vpop.f32.mrb[7].mxu1  ;;  %v1400_v48 = vld [vmem:[%s2470_s5] sm:$0x3] }
 0x1e8   :  { %v809_v63 = vadd.f32 %v808_v62, %v707_v29  ;;  %v818_v16 = vpop.f32.mrb[16].mxu0  ;;  %v2475_v29 = vsub.s32 1, %v2099_v40 }
 0x1e9   :  { %v820_v20 = vpop.f32.mrb[17].mxu0 }
 0x1ea   :  { %v711_v33 = vpop.f32.mrb[8].mxu1 }
 0x1eb   :  { %v813_v6 = vadd.f32 %v812_v1, %v711_v33  ;;  %v713_v23 = vpop.f32.mrb[9].mxu1 }
 0x1ec   :  { %v815_v35 = vadd.f32 %v814_v14, %v713_v23  ;;  %v824_v15 = vpop.f32.mrb[18].mxu0  ;;  %v1405_v14 = vrot.slane %v1400_v48, %v71_v41 }
 0x1ed   :  { %v826_v10 = vpop.f32.mrb[19].mxu0 }
 0x1ee   :  { %v717_v0 = vpop.f32.mrb[10].mxu1 }
 0x1ef   :  { %v819_v11 = vadd.f32 %v818_v16, %v717_v0  ;;  %v719_v5 = vpop.f32.mrb[11].mxu1 }
 0x1f0   :  { %v821_v42 = vadd.f32 %v820_v20, %v719_v5  ;;  %v830_v60 = vpop.f32.mrb[20].mxu0 }
 0x1f1   :  { %v832_v7 = vpop.f32.mrb[21].mxu0 }
 0x1f2   :  { %v723_v38 = vpop.f32.mrb[12].mxu1 }
 0x1f3   :  { %v825_v32 = vadd.f32 %v824_v15, %v723_v38  ;;  %v725_v47 = vpop.f32.mrb[13].mxu1 }
 0x1f4   :  { %v827_v43 = vadd.f32 %v826_v10, %v725_v47  ;;  %v836_v17 = vpop.f32.mrb[22].mxu0 }
 0x1f5   :  { %v838_v34 = vpop.f32.mrb[23].mxu0 }
 0x1f6   :  { %v729_v24 = vpop.f32.mrb[14].mxu1 }
 0x1f7   :  { %v831_v39 = vadd.f32 %v830_v60, %v729_v24  ;;  %v731_v56 = vpop.f32.mrb[15].mxu1 }
 0x1f8   :  { %v833_v49 = vadd.f32 %v832_v7, %v731_v56 }
 0x1fa   :  { %v735_v25 = vpop.f32.mrb[16].mxu1 }
 0x1fb   :  { %v837_v26 = vadd.f32 %v836_v17, %v735_v25  ;;  %v737_v3 = vpop.f32.mrb[17].mxu1 }
 0x1fc   :  { %v839_v8 = vadd.f32 %v838_v34, %v737_v3 }
 0x226   :  { %v919_v9 = vpop.f32.mrb[18].mxu1 }
 0x227   :  { %v920_v51 = vadd.f32 %v919_v9, %v807_v18  ;;  %v921_v27 = vpop.f32.mrb[19].mxu1 }
 0x228   :  { %v922_v2 = vadd.f32 %v921_v27, %v809_v63  ;;  %v1409_v63 = vrot.slane %v1400_v48, %v2475_v29 }
 0x22a   :  { %v925_v52 = vpop.f32.mrb[20].mxu1 }
 0x22b   :  { %v926_v53 = vadd.f32 %v925_v52, %v813_v6  ;;  %v927_v4 = vpop.f32.mrb[21].mxu1 }
 0x22c   :  { %v928_v21 = vadd.f32 %v927_v4, %v815_v35 }
 0x22e   :  { %v931_v22 = vpop.f32.mrb[22].mxu1 }
 0x22f   :  { %v932_v19 = vadd.f32 %v931_v22, %v819_v11  ;;  %v933_v57 = vpop.f32.mrb[23].mxu1 }
 0x230   :  { %v934_v44 = vadd.f32 %v933_v57, %v821_v42 }
 0x232   :  { %v937_v30 = vpop.f32.mrb[24].mxu1 }
 0x233   :  { %v938_v46 = vadd.f32 %v937_v30, %v825_v32  ;;  %v939_v36 = vpop.f32.mrb[25].mxu1 }
 0x234   :  { %v940_v12 = vadd.f32 %v939_v36, %v827_v43 }
 0x236   :  { %v943_v31 = vpop.f32.mrb[26].mxu1 }
 0x237   :  { %v944_v55 = vadd.f32 %v943_v31, %v831_v39  ;;  %v945_v37 = vpop.f32.mrb[27].mxu1 }
 0x238   :  { %v2419_v54 = vadd.f32 %v945_v37, %v833_v49 }
 0x23a   :  { %v949_v50 = vpop.f32.mrb[28].mxu1 }
 0x23b   :  { %v950_v28 = vadd.f32 %v949_v50, %v837_v26  ;;  %v951_v59 = vpop.f32.mrb[29].mxu1 }
 0x23c   :  { %v952_v58 = vadd.f32 %v951_v59, %v839_v8 }
 0x23e   :  { %v1383_v61 = vpop.f32.mrb[30].mxu1 }
 0x23f   :  { %v1385_v13 = vpop.f32.mrb[31].mxu1 }
 0x24c   :  { %v1282_v62 = vpop.f32.mrb[34].mxu0 }
 0x24d   :  { %v1815_v1 = vadd.f32 %v1282_v62, %v950_v28  ;;  %v1284_v45 = vpop.f32.mrb[35].mxu0 }
 0x24e   :  { %v1819_v18 = vadd.f32 %v1284_v45, %v952_v58 }
 0x24f   :  { %v1816_v16 = vadd.f32 %v1815_v1, %v1383_v61 }
 0x250   :  { %v1820_v20 = vadd.f32 %v1819_v18, %v1385_v13  ;;  %v1353_v33 = vpop.f32.mrb[24].mxu0 }
 0x251   :  { %v1422_v6 = vadd.f32 %v1816_v16, %v1405_v14  ;;  %v1785_v23 = vadd.f32 %v1353_v33, %v920_v51  ;;  %v1355_v35 = vpop.f32.mrb[25].mxu0 }
 0x252   :  { %v1423_v15 = vadd.f32 %v1820_v20, %v1409_v63  ;;  %v1788_v10 = vadd.f32 %v1355_v35, %v922_v2 }
 0x253   :  { %1851 = vtanh.f32 %v1422_v6  ;;  %v1412_v0 = vadd.f32 %v1785_v23, %v1405_v14 }
 0x254   :  { %1853 = vtanh.f32 %v1423_v15  ;;  %v1413_v11 = vadd.f32 %v1788_v10, %v1409_v63  ;;  %v1359_v5 = vpop.f32.mrb[26].mxu0 }
 0x255   :  { %1855 = vtanh.f32 %v1412_v0  ;;  %v1791_v41 = vadd.f32 %v1359_v5, %v926_v53  ;;  %v1361_v42 = vpop.f32.mrb[27].mxu0 }
 0x256   :  { %1857 = vtanh.f32 %v1413_v11  ;;  %v1794_v60 = vadd.f32 %v1361_v42, %v928_v21 }
 0x257   :  { %v1414_v40 = vadd.f32 %v1791_v41, %v1405_v14 }
 0x258   :  { %v1415_v7 = vadd.f32 %v1794_v60, %v1409_v63  ;;  %v1365_v38 = vpop.f32.mrb[28].mxu0 }
 0x259   :  { %1859 = vtanh.f32 %v1414_v40  ;;  %v1797_v32 = vadd.f32 %v1365_v38, %v932_v19  ;;  %v1367_v47 = vpop.f32.mrb[29].mxu0 }
 0x25a   :  { %1861 = vtanh.f32 %v1415_v7  ;;  %v1800_v43 = vadd.f32 %v1367_v47, %v934_v44 }
 0x25b   :  { %v1416_v17 = vadd.f32 %v1797_v32, %v1405_v14 }
 0x25c   :  { %v1417_v34 = vadd.f32 %v1800_v43, %v1409_v63  ;;  %v1371_v24 = vpop.f32.mrb[30].mxu0 }
 0x25d   :  { %v1852_v39 = vpop.eup %1851  ;;  %1863 = vtanh.f32 %v1416_v17  ;;  %v1803_v56 = vadd.f32 %v1371_v24, %v938_v46  ;;  %v1373_v49 = vpop.f32.mrb[31].mxu0 }
 0x25e   :  { %v1854_v25 = vpop.eup %1853  ;;  %1446 = vst [vmem:[%s2471_s6 + $0x50] sm:$0x3f] %v1852_v39  ;;  %1865 = vtanh.f32 %v1417_v34  ;;  %v1806_v26 = vadd.f32 %v1373_v49, %v940_v12 }
 0x25f   :  { %v1856_v3 = vpop.eup %1855  ;;  %1447 = vst [vmem:[%s2471_s6 + $0x58] sm:$0x3f] %v1854_v25  ;;  %v1418_v8 = vadd.f32 %v1803_v56, %v1405_v14 }
 0x260   :  { %v1858_v9 = vpop.eup %1857  ;;  %1436 = vst [vmem:[%s2471_s6] sm:$0xff] %v1856_v3  ;;  %v1419_v51 = vadd.f32 %v1806_v26, %v1409_v63  ;;  %v1377_v27 = vpop.f32.mrb[32].mxu0 }
 0x261   :  { %1437 = vst [vmem:[%s2471_s6 + $0x8] sm:$0xff] %v1858_v9  ;;  %1867 = vtanh.f32 %v1418_v8  ;;  %v1809_v2 = vadd.f32 %v1377_v27, %v944_v55  ;;  %v1379_v52 = vpop.f32.mrb[33].mxu0 }
 0x262   :  { %1869 = vtanh.f32 %v1419_v51  ;;  %v1812_v53 = vadd.f32 %v1379_v52, %v2419_v54 }
 0x263   :  { %v1860_v4 = vpop.eup %1859  ;;  %v1420_v21 = vadd.f32 %v1809_v2, %v1405_v14 }
 0x264   :  { %v1862_v22 = vpop.eup %1861  ;;  %1438 = vst [vmem:[%s2471_s6 + $0x10] sm:$0xff] %v1860_v4  ;;  %v1421_v19 = vadd.f32 %v1812_v53, %v1409_v63 }
 0x265   :  { %1439 = vst [vmem:[%s2471_s6 + $0x18] sm:$0xff] %v1862_v22  ;;  %1871 = vtanh.f32 %v1420_v21 }
 0x266   :  { %1873 = vtanh.f32 %v1421_v19 }
 0x267   :  { %v1864_v57 = vpop.eup %1863 }
 0x268   :  { %v1866_v44 = vpop.eup %1865  ;;  %1440 = vst [vmem:[%s2471_s6 + $0x20] sm:$0xff] %v1864_v57 }
 0x269   :  { %1441 = vst [vmem:[%s2471_s6 + $0x28] sm:$0xff] %v1866_v44 }
 0x26b   :  { %v1868_v30 = vpop.eup %1867 }
 0x26c   :  { %v1870_v46 = vpop.eup %1869  ;;  %1442 = vst [vmem:[%s2471_s6 + $0x30] sm:$0xff] %v1868_v30 }
 0x26d   :  { %1443 = vst [vmem:[%s2471_s6 + $0x38] sm:$0xff] %v1870_v46 }
 0x26f   :  { %v1872_v36 = vpop.eup %1871 }
 0x270   :  { %v1874_v12 = vpop.eup %1873  ;;  %1444 = vst [vmem:[%s2471_s6 + $0x40] sm:$0xff] %v1872_v36 }
 0x271   :  { %1445 = vst [vmem:[%s2471_s6 + $0x48] sm:$0xff] %v1874_v12 }
 0x272   :  { %1454 = vsyncpa [#allocation3], 1 }

</bundles_post_ra>
